<compile_context>
chip_gen: v5e
topology: v5e:2x2
jax: 0.10.0
libtpu: 0.0.40
codegen_flags: <defaults>
</compile_context>

<pallas_src>
import jax
import jax.numpy as jnp
import numpy as np
from jax.experimental import pallas as pl
from jax.experimental.pallas import tpu as pltpu

EPS = 1e-5


# ----------------------------------------------------------------------------
# Kernel A: channel gate + spatial BN statistics (grid over per-image row tiles)
# ----------------------------------------------------------------------------
def _make_stats_kernel(total_rows):
    inv_m = 1.0 / float(total_rows)

    def kernel(ci_ref, w1_ref, w2_ref, gc_ref, bc_ref, gs_ref, bs_ref,
               patch_ref, wsp_ref,
               cscale_ref, ss_ref, ts_ref,
               ssum_ref, ssq_ref):
        f32 = jnp.float32
        step = pl.program_id(0)

        @pl.when(step == 0)
        def _init():
            ssum_ref[...] = jnp.zeros_like(ssum_ref)
            ssq_ref[...] = jnp.zeros_like(ssq_ref)

        # 7x7 spatial conv of this row tile: one MXU matmul against the
        # lane-replicated weight -> (HW, C) lane-dense, f32 accumulation.
        sconv = jnp.dot(patch_ref[...], wsp_ref[...], preferred_element_type=f32)
        ssum_ref[...] += jnp.sum(sconv, axis=0, keepdims=True)
        ssq_ref[...] += jnp.sum(sconv * sconv, axis=0, keepdims=True)

        @pl.when(step == pl.num_programs(0) - 1)
        def _finalize():
            # spatial BatchNorm(1) training statistics, folded into a
            # lane-replicated (1, C) scale/shift; clamp variance >= 0.
            ms = ssum_ref[...] * inv_m
            vs = jnp.maximum(ssq_ref[...] * inv_m - ms * ms, 0.0)
            s_scale = gs_ref[0, 0] * jax.lax.rsqrt(vs + EPS)
            ss_ref[...] = s_scale
            ts_ref[...] = bs_ref[0, 0] - ms * s_scale

            # channel branch: 1x1 conv -> ReLU -> 1x1 conv -> BN(train) -> sigmoid
            h = jnp.dot(ci_ref[...], w1_ref[...], preferred_element_type=f32)
            h = jnp.maximum(h, 0.0)
            y = jnp.dot(h.astype(jnp.bfloat16), w2_ref[...],
                        preferred_element_type=f32)                    # (N, C)
            mu = jnp.mean(y, axis=0, keepdims=True)
            d = y - mu
            var = jnp.mean(d * d, axis=0, keepdims=True)               # two-pass
            c_scale = gc_ref[...] * jax.lax.rsqrt(var + EPS)
            zc = y * c_scale + (bc_ref[...] - mu * c_scale)
            cscale_ref[...] = 1.0 / (1.0 + jnp.exp(-zc))

    return kernel


# ----------------------------------------------------------------------------
# Kernel B: row-tiled combine (spatial gate recomputed lane-dense on the MXU)
# ----------------------------------------------------------------------------
def _combine_kernel(cs_ref, ss_ref, ts_ref, patch_ref, wsp_ref, x_ref,
                    xid_ref, xage_ref):
    f32 = jnp.float32
    sconv = jnp.dot(patch_ref[...], wsp_ref[...], preferred_element_type=f32)
    sscale = 1.0 / (1.0 + jnp.exp(-(sconv * ss_ref[...] + ts_ref[...])))  # (HW, C)
    gate = 0.5 * (cs_ref[0] + sscale)                                     # (HW, C)
    xb = x_ref[...]
    age = xb * gate
    xage_ref[...] = age
    xid_ref[...] = xb - age


def _attention_pallas(ci, w1m, w2m, gc, bc, gs, bs, patches, wsp_mat, x2d,
                      n_batch, rows_per_image):
    M, C = x2d.shape
    N, HW = n_batch, rows_per_image
    Kpad = patches.shape[1]
    f32 = jnp.float32
    smem = pl.BlockSpec(memory_space=pltpu.MemorySpace.SMEM)

    # ---- Kernel A: gates & statistics --------------------------------------
    cscale, ss, ts = pl.pallas_call(
        _make_stats_kernel(M),
        out_shape=(jax.ShapeDtypeStruct((N, C), f32),
                   jax.ShapeDtypeStruct((1, C), f32),
                   jax.ShapeDtypeStruct((1, C), f32)),
        grid=(N,),
        in_specs=[
            pl.BlockSpec(ci.shape, lambda i: (0, 0)),        # SPP channel input
            pl.BlockSpec(w1m.shape, lambda i: (0, 0)),       # conv1 weight
            pl.BlockSpec(w2m.shape, lambda i: (0, 0)),       # conv2 weight
            pl.BlockSpec((1, C), lambda i: (0, 0)),          # channel BN gamma
            pl.BlockSpec((1, C), lambda i: (0, 0)),          # channel BN beta
            smem,                                            # spatial BN gamma
            smem,                                            # spatial BN beta
            pl.BlockSpec((HW, Kpad), lambda i: (i, 0)),      # im2col patches
            pl.BlockSpec((Kpad, C), lambda i: (0, 0)),       # 7x7 conv weight
        ],
        out_specs=(
            pl.BlockSpec((N, C), lambda i: (0, 0)),
            pl.BlockSpec((1, C), lambda i: (0, 0)),
            pl.BlockSpec((1, C), lambda i: (0, 0)),
        ),
        scratch_shapes=[pltpu.VMEM((1, C), f32), pltpu.VMEM((1, C), f32)],
        compiler_params=pltpu.CompilerParams(
            dimension_semantics=("arbitrary",)),
    )(ci, w1m, w2m, gc, bc, gs, bs, patches, wsp_mat)

    cscale3 = cscale.reshape(N, 1, C)

    # ---- Kernel B: row-tiled combine ("parallel" -> both cores on v7x) -----
    xid2d, xage2d = pl.pallas_call(
        _combine_kernel,
        out_shape=(jax.ShapeDtypeStruct((M, C), f32),
                   jax.ShapeDtypeStruct((M, C), f32)),
        grid=(N,),
        in_specs=[
            pl.BlockSpec((1, 1, C), lambda i: (i, 0, 0)),    # per-image cscale
            pl.BlockSpec((1, C), lambda i: (0, 0)),          # spatial BN scale
            pl.BlockSpec((1, C), lambda i: (0, 0)),          # spatial BN shift
            pl.BlockSpec((HW, Kpad), lambda i: (i, 0)),      # im2col patches
            pl.BlockSpec((Kpad, C), lambda i: (0, 0)),       # 7x7 conv weight
            pl.BlockSpec((HW, C), lambda i: (i, 0)),         # x rows
        ],
        out_specs=(pl.BlockSpec((HW, C), lambda i: (i, 0)),
                   pl.BlockSpec((HW, C), lambda i: (i, 0))),
        input_output_aliases={5: 0},                         # x2d buffer -> x_id
        compiler_params=pltpu.CompilerParams(
            dimension_semantics=("parallel",)),
    )(cscale3, ss, ts, patches, wsp_mat, x2d)
    return xid2d, xage2d


# ----------------------------------------------------------------------------
# Plain-JAX glue: SPP pooling, channel max/mean, im2col, weight layouts
# ----------------------------------------------------------------------------
def _adaptive_bins(out_size, length):
    # torch AdaptiveAvg/MaxPool2d bins: [floor(i*L/s), ceil((i+1)*L/s))
    return [((i * length) // out_size, -(-((i + 1) * length) // out_size))
            for i in range(out_size)]


def _spp_channel_input_fast(x_nhwc, pool_size):
    """avg_spp(x) + max_spp(x), flattened in torch NCHW order -> (N, C*sum(s^2)).
    Uses reshape-then-reduce when the pool size divides H and W (identical to
    the adaptive-pool bins in that case); explicit bins otherwise."""
    N, H, W, C = x_nhwc.shape
    parts = []
    for s in pool_size:
        if H % s == 0 and W % s == 0:
            r = x_nhwc.reshape(N, s, H // s, s, W // s, C)
            pooled = jnp.mean(r, axis=(2, 4)) + jnp.max(r, axis=(2, 4))  # (N,s,s,C)
            blk = jnp.transpose(pooled, (0, 3, 1, 2))                    # (N,C,s,s)
        else:
            hb, wb = _adaptive_bins(s, H), _adaptive_bins(s, W)
            cells = [jnp.mean(x_nhwc[:, h0:h1, w0:w1, :], axis=(1, 2)) +
                     jnp.max(x_nhwc[:, h0:h1, w0:w1, :], axis=(1, 2))
                     for (h0, h1) in hb for (w0, w1) in wb]
            blk = jnp.stack(cells, axis=-1).reshape(N, C, s, s)
        parts.append(blk.reshape(N, C * s * s))
    return jnp.concatenate(parts, axis=1)


def _spp_channel_input_ref(x_nhwc, pool_size):
    """Slice-based SPP (independent cross-check for the reference)."""
    N, H, W, C = x_nhwc.shape
    parts = []
    for s in pool_size:
        hb, wb = _adaptive_bins(s, H), _adaptive_bins(s, W)
        cells = []
        for (h0, h1) in hb:
            for (w0, w1) in wb:
                win = x_nhwc[:, h0:h1, w0:w1, :]
                cells.append(jnp.mean(win, axis=(1, 2)) + jnp.max(win, axis=(1, 2)))
        parts.append(jnp.stack(cells, axis=-1).reshape(N, C * s * s))
    return jnp.concatenate(parts, axis=1)


def _im2col_spatial(smap_nhwc, ksize, pad):
    """(N,H,W,Cin) -> (N*H*W, Cin*k*k); column order cin*k*k + di*k + dj.
    Built from 2k slices (row shifts then column shifts) instead of k^2."""
    N, H, W, Cin = smap_nhwc.shape
    xp = jnp.pad(smap_nhwc, ((0, 0), (pad, pad), (pad, pad), (0, 0)))
    rows = jnp.stack([xp[:, di:di + H, :, :] for di in range(ksize)], axis=-1)
    cols = jnp.stack([rows[:, :, dj:dj + W, :, :] for dj in range(ksize)], axis=-1)
    return cols.reshape(N * H * W, Cin * ksize * ksize)


def attention_forward(x_nchw, params, pool_size=(1, 2, 3)):
    """Pallas-backed AttentionModule.forward: returns (x_id, x_age), both NCHW."""
    N, C, H, W = x_nchw.shape
    bf16, f32 = jnp.bfloat16, jnp.float32
    HW = H * W
    assert HW % 8 == 0, "H*W must be a multiple of 8 (TPU sublane tiling)"

    xh = jnp.transpose(x_nchw, (0, 2, 3, 1)).astype(f32)      # NHWC, C on lanes

    # channel-branch input: SPP(avg) + SPP(max), torch flatten/concat order
    ci = _spp_channel_input_fast(xh, pool_size)                # (N, C*sum(s^2))

    # spatial-branch input: cat(max_c(x), mean_c(x)) -> im2col for the 7x7 conv
    smap = jnp.stack([jnp.max(xh, axis=3), jnp.mean(xh, axis=3)], axis=-1)
    ksize = params['w_sp'].shape[-1]
    pad = (ksize - 1) // 2
    kk2 = 2 * ksize * ksize
    patches = _im2col_spatial(smap, ksize, pad)                # (N*H*W, 2*k*k)
    kpad = ((kk2 + 127) // 128) * 128                          # unmasked K tiles
    patches = jnp.pad(patches, ((0, 0), (0, kpad - kk2))).astype(bf16)

    # weights -> matmul layouts; bf16 operands for the MXU
    mid = params['w_c1'].shape[0]
    w1m = params['w_c1'].reshape(mid, -1).T.astype(bf16)       # (C*sum(s^2), mid)
    w2m = params['w_c2'].reshape(C, mid).T.astype(bf16)        # (mid, C)
    # 7x7 conv weight lane-replicated across C output columns, K zero-padded
    w_flat = params['w_sp'].reshape(kk2, 1).astype(f32)
    wsp_mat = jnp.zeros((kpad, C), f32).at[:kk2, :].set(
        jnp.broadcast_to(w_flat, (kk2, C))).astype(bf16)

    gc = params['g_c'].reshape(1, C).astype(f32)
    bc = params['b_c'].reshape(1, C).astype(f32)
    gs = params['g_sp'].reshape(1, 1).astype(f32)
    bs = params['b_sp'].reshape(1, 1).astype(f32)

    x2d = xh.reshape(N * HW, C)

    xid2d, xage2d = _attention_pallas(ci.astype(bf16), w1m, w2m, gc, bc,
                                      gs, bs, patches, wsp_mat, x2d,
                                      n_batch=N, rows_per_image=HW)

    to_nchw = lambda t: jnp.transpose(t.reshape(N, H, W, C), (0, 3, 1, 2))
    return to_nchw(xid2d), to_nchw(xage2d)


def init_params(key, channels, kernel_size=7, pool_size=(1, 2, 3), reduction=16):
    _ch = channels * sum(s * s for s in pool_size)
    mid = _ch // reduction
    k = jax.random.split(key, 7)
    return {
        # spatial: Conv2d(2, 1, k, pad=(k-1)//2, bias=False) + BatchNorm2d(1)
        'w_sp': jax.random.normal(k[0], (1, 2, kernel_size, kernel_size), jnp.float32)
                * (2.0 / (2 * kernel_size * kernel_size)) ** 0.5,
        'g_sp': 1.0 + 0.1 * jax.random.normal(k[1], (1,), jnp.float32),
        'b_sp': 0.1 * jax.random.normal(k[2], (1,), jnp.float32),
        # channel: Conv2d(_ch, mid, 1, bias=False) -> ReLU ->
        #          Conv2d(mid, C, 1, bias=False) -> BatchNorm2d(C)
        'w_c1': jax.random.normal(k[3], (mid, _ch, 1, 1), jnp.float32) * (1.0 / _ch) ** 0.5,
        'w_c2': jax.random.normal(k[4], (channels, mid, 1, 1), jnp.float32) * (1.0 / mid) ** 0.5,
        'g_c': 1.0 + 0.1 * jax.random.normal(k[5], (channels,), jnp.float32),
        'b_c': 0.1 * jax.random.normal(k[6], (channels,), jnp.float32),
    }


# ----------------------------------------------------------------------------
# Pure-JAX reference (no Pallas), mirroring the bf16-operand / f32-accumulate
# matmul precision policy of the kernel; everything else in f32.
# ----------------------------------------------------------------------------
def reference_forward(x_nchw, params, pool_size=(1, 2, 3)):
    N, C, H, W = x_nchw.shape
    bf16, f32 = jnp.bfloat16, jnp.float32
    xh = jnp.transpose(x_nchw, (0, 2, 3, 1)).astype(f32)

    # channel branch
    ci = _spp_channel_input_ref(xh, pool_size)
    mid = params['w_c1'].shape[0]
    w1 = params['w_c1'].reshape(mid, -1)
    h = jnp.maximum(jnp.dot(ci.astype(bf16), w1.T.astype(bf16),
                            preferred_element_type=f32), 0.0)
    w2 = params['w_c2'].reshape(C, mid)
    y = jnp.dot(h.astype(bf16), w2.T.astype(bf16), preferred_element_type=f32)
    mu = jnp.mean(y, axis=0)
    var = jnp.mean((y - mu) ** 2, axis=0)                     # biased (train mode)
    ybn = (y - mu) * jax.lax.rsqrt(var + EPS) * params['g_c'] + params['b_c']
    cscale = jax.nn.sigmoid(ybn)                              # (N, C)

    # spatial branch
    smap = jnp.stack([jnp.max(xh, axis=3), jnp.mean(xh, axis=3)], axis=-1)
    ksize = params['w_sp'].shape[-1]
    pad = (ksize - 1) // 2
    w_hwio = jnp.transpose(params['w_sp'], (2, 3, 1, 0))
    sconv = jax.lax.conv_general_dilated(
        smap.astype(bf16), w_hwio.astype(bf16), (1, 1),
        [(pad, pad), (pad, pad)],
        dimension_numbers=('NHWC', 'HWIO', 'NHWC'),
        preferred_element_type=f32)                           # (N, H, W, 1)
    ms = jnp.mean(sconv)
    vs = jnp.mean((sconv - ms) ** 2)
    sbn = (sconv - ms) * jax.lax.rsqrt(vs + EPS) * params['g_sp'] + params['b_sp']
    sscale = jax.nn.sigmoid(sbn)                              # (N, H, W, 1)

    x_age = (xh * cscale[:, None, None, :] + xh * sscale) * 0.5
    x_id = xh - x_age
    to_nchw = lambda t: jnp.transpose(t, (0, 3, 1, 2))
    return to_nchw(x_id), to_nchw(x_age)


# ----------------------------------------------------------------------------
if __name__ == "__main__":
    # TPU-friendly small shapes: channels=128 (lane-dense), H=W=12 so every
    # adaptive pool size in (1,2,3) divides evenly, batch=4 for BN statistics.
    N, C, H, W = 4, 128, 12, 12
    pool_size = (1, 2, 3)
    kernel_size = 7
    reduction = 16

    root = jax.random.PRNGKey(0)
    kx, kp = jax.random.split(root)
    x = jax.random.normal(kx, (N, C, H, W), jnp.float32)
    params = init_params(kp, channels=C, kernel_size=kernel_size,
                         pool_size=pool_size, reduction=reduction)

    fwd = jax.jit(lambda xx, pp: attention_forward(xx, pp, pool_size))
    x_id, x_age = jax.block_until_ready(fwd(x, params))
    assert x_id.shape == (N, C, H, W) and x_age.shape == (N, C, H, W)

    r_id, r_age = jax.block_until_ready(reference_forward(x, params, pool_size))
    np.testing.assert_allclose(np.asarray(x_age), np.asarray(r_age), rtol=2e-3, atol=2e-3)
    np.testing.assert_allclose(np.asarray(x_id), np.asarray(r_id), rtol=2e-3, atol=2e-3)
    print("KERNEL_OK")
</pallas_src>

<mosaic_0001>
module attributes {stable_mosaic.version = 11 : i64} {
  func.func @kernel(%arg0: i32, %arg1: memref<4x1792xbf16, #tpu.memory_space<vmem>>, %arg2: memref<1792x112xbf16, #tpu.memory_space<vmem>>, %arg3: memref<112x128xbf16, #tpu.memory_space<vmem>>, %arg4: memref<1x128xf32, #tpu.memory_space<vmem>>, %arg5: memref<1x128xf32, #tpu.memory_space<vmem>>, %arg6: memref<1x1xf32, #tpu.memory_space<smem>>, %arg7: memref<1x1xf32, #tpu.memory_space<smem>>, %arg8: memref<144x128xbf16, #tpu.memory_space<vmem>>, %arg9: memref<128x128xbf16, #tpu.memory_space<vmem>>, %arg10: memref<4x128xf32, #tpu.memory_space<vmem>>, %arg11: memref<1x128xf32, #tpu.memory_space<vmem>>, %arg12: memref<1x128xf32, #tpu.memory_space<vmem>>, %arg13: memref<1x128xf32, #tpu.memory_space<vmem>>, %arg14: memref<1x128xf32, #tpu.memory_space<vmem>>) attributes {dimension_semantics = [#tpu.dimension_semantics<arbitrary>], iteration_bounds = array<i64: 4>, scalar_prefetch = 0 : i64, scratch_operands = 2 : i64, tpu.core_type = #tpu.core_type<tc>, window_params = [{pipeline_mode = #tpu.pipeline_mode<synchronous>, transform_indices = @transform_0, window_bounds = array<i64: 4, 1792>}, {pipeline_mode = #tpu.pipeline_mode<synchronous>, transform_indices = @transform_1, window_bounds = array<i64: 1792, 112>}, {pipeline_mode = #tpu.pipeline_mode<synchronous>, transform_indices = @transform_2, window_bounds = array<i64: 112, 128>}, {pipeline_mode = #tpu.pipeline_mode<synchronous>, transform_indices = @transform_3, window_bounds = array<i64: 1, 128>}, {pipeline_mode = #tpu.pipeline_mode<synchronous>, transform_indices = @transform_4, window_bounds = array<i64: 1, 128>}, {transform_indices = @transform_5, window_bounds = array<i64: 1, 1>}, {transform_indices = @transform_6, window_bounds = array<i64: 1, 1>}, {transform_indices = @transform_7, window_bounds = array<i64: 144, 128>}, {pipeline_mode = #tpu.pipeline_mode<synchronous>, transform_indices = @transform_8, window_bounds = array<i64: 128, 128>}, {pipeline_mode = #tpu.pipeline_mode<synchronous>, transform_indices = @transform_9, window_bounds = array<i64: 4, 128>}, {pipeline_mode = #tpu.pipeline_mode<synchronous>, transform_indices = @transform_10, window_bounds = array<i64: 1, 128>}, {pipeline_mode = #tpu.pipeline_mode<synchronous>, transform_indices = @transform_11, window_bounds = array<i64: 1, 128>}]} {
    %c0_i32 = arith.constant 0 : i32
    %0 = arith.cmpi eq, %arg0, %c0_i32 : i32
    %1 = arith.extui %0 : i1 to i32
    %c0_i32_0 = arith.constant 0 : i32
    %2 = arith.cmpi ne, %1, %c0_i32_0 : i32
    scf.if %2 {
      %cst_15 = arith.constant 0.000000e+00 : f32
      %20 = vector.broadcast %cst_15 : f32 to vector<1x128xf32>
      %c0_16 = arith.constant 0 : index
      %c0_17 = arith.constant 0 : index
      %21 = vector.load %arg13[%c0_16, %c0_17] : memref<1x128xf32, #tpu.memory_space<vmem>>, vector<1x128xf32>
      tpu.vector_store %arg13[%c0_16, %c0_17], %20 {strides = array<i32>} : memref<1x128xf32, #tpu.memory_space<vmem>>, vector<1x128xf32>,
      %cst_18 = arith.constant 0.000000e+00 : f32
      %22 = vector.broadcast %cst_18 : f32 to vector<1x128xf32>
      %c0_19 = arith.constant 0 : index
      %c0_20 = arith.constant 0 : index
      %23 = vector.load %arg14[%c0_19, %c0_20] : memref<1x128xf32, #tpu.memory_space<vmem>>, vector<1x128xf32>
      tpu.vector_store %arg14[%c0_19, %c0_20], %22 {strides = array<i32>} : memref<1x128xf32, #tpu.memory_space<vmem>>, vector<1x128xf32>,
    } else {
    }
    %c0 = arith.constant 0 : index
    %c0_1 = arith.constant 0 : index
    %3 = vector.load %arg8[%c0, %c0_1] : memref<144x128xbf16, #tpu.memory_space<vmem>>, vector<144x128xbf16>
    %c0_2 = arith.constant 0 : index
    %c0_3 = arith.constant 0 : index
    %4 = vector.load %arg9[%c0_2, %c0_3] : memref<128x128xbf16, #tpu.memory_space<vmem>>, vector<128x128xbf16>
    %cst = arith.constant dense<0.000000e+00> : vector<144x128xf32>
    %5 = tpu.matmul %3, %4, %cst {dimension_numbers = #tpu.dot_dimension_numbers<[1], [0], [0], [1], [0, 0, 1, 1], [], []>} : vector<144x128xbf16>, vector<128x128xbf16>, vector<144x128xf32> -> vector<144x128xf32>
    %c0_4 = arith.constant 0 : index
    %c0_5 = arith.constant 0 : index
    %6 = vector.load %arg13[%c0_4, %c0_5] : memref<1x128xf32, #tpu.memory_space<vmem>>, vector<1x128xf32>
    %cst_6 = arith.constant dense<0.000000e+00> : vector<128xf32>
    %7 = vector.multi_reduction <add>, %5, %cst_6 [0] : vector<144x128xf32> to vector<128xf32>
    %8 = vector.shape_cast %7 : vector<128xf32> to vector<1x128xf32>
    %9 = arith.addf %6, %8 : vector<1x128xf32>
    %c0_7 = arith.constant 0 : index
    %c0_8 = arith.constant 0 : index
    %10 = vector.load %arg13[%c0_7, %c0_8] : memref<1x128xf32, #tpu.memory_space<vmem>>, vector<1x128xf32>
    tpu.vector_store %arg13[%c0_7, %c0_8], %9 {strides = array<i32>} : memref<1x128xf32, #tpu.memory_space<vmem>>, vector<1x128xf32>,
    %c0_9 = arith.constant 0 : index
    %c0_10 = arith.constant 0 : index
    %11 = vector.load %arg14[%c0_9, %c0_10] : memref<1x128xf32, #tpu.memory_space<vmem>>, vector<1x128xf32>
    %12 = arith.mulf %5, %5 : vector<144x128xf32>
    %cst_11 = arith.constant dense<0.000000e+00> : vector<128xf32>
    %13 = vector.multi_reduction <add>, %12, %cst_11 [0] : vector<144x128xf32> to vector<128xf32>
    %14 = vector.shape_cast %13 : vector<128xf32> to vector<1x128xf32>
    %15 = arith.addf %11, %14 : vector<1x128xf32>
    %c0_12 = arith.constant 0 : index
    %c0_13 = arith.constant 0 : index
    %16 = vector.load %arg14[%c0_12, %c0_13] : memref<1x128xf32, #tpu.memory_space<vmem>>, vector<1x128xf32>
    tpu.vector_store %arg14[%c0_12, %c0_13], %15 {strides = array<i32>} : memref<1x128xf32, #tpu.memory_space<vmem>>, vector<1x128xf32>,
    %c3_i32 = arith.constant 3 : i32
    %17 = arith.cmpi eq, %arg0, %c3_i32 : i32
    %18 = arith.extui %17 : i1 to i32
    %c0_i32_14 = arith.constant 0 : i32
    %19 = arith.cmpi ne, %18, %c0_i32_14 : i32
    scf.if %19 {
      %c0_15 = arith.constant 0 : index
      %c0_16 = arith.constant 0 : index
      %20 = vector.load %arg13[%c0_15, %c0_16] : memref<1x128xf32, #tpu.memory_space<vmem>>, vector<1x128xf32>
      %cst_17 = arith.constant 0.00173611112 : f32
      %21 = vector.broadcast %cst_17 : f32 to vector<1x128xf32>
      %22 = arith.mulf %20, %21 : vector<1x128xf32>
      %c0_18 = arith.constant 0 : index
      %c0_19 = arith.constant 0 : index
      %23 = vector.load %arg14[%c0_18, %c0_19] : memref<1x128xf32, #tpu.memory_space<vmem>>, vector<1x128xf32>
      %cst_20 = arith.constant 0.00173611112 : f32
      %24 = vector.broadcast %cst_20 : f32 to vector<1x128xf32>
      %25 = arith.mulf %23, %24 : vector<1x128xf32>
      %26 = arith.mulf %22, %22 : vector<1x128xf32>
      %27 = arith.subf %25, %26 : vector<1x128xf32>
      %cst_21 = arith.constant 0.000000e+00 : f32
      %28 = vector.broadcast %cst_21 : f32 to vector<1x128xf32>
      %29 = arith.maximumf %27, %28 : vector<1x128xf32>
      %c0_22 = arith.constant 0 : index
      %c0_23 = arith.constant 0 : index
      %30 = memref.load %arg6[%c0_22, %c0_23] : memref<1x1xf32, #tpu.memory_space<smem>>
      %cst_24 = arith.constant 9.99999974E-6 : f32
      %31 = vector.broadcast %cst_24 : f32 to vector<1x128xf32>
      %32 = arith.addf %29, %31 : vector<1x128xf32>
      %33 = math.rsqrt %32 : vector<1x128xf32>
      %34 = vector.broadcast %30 : f32 to vector<1x128xf32>
      %35 = arith.mulf %34, %33 : vector<1x128xf32>
      %c0_25 = arith.constant 0 : index
      %c0_26 = arith.constant 0 : index
      %36 = vector.load %arg11[%c0_25, %c0_26] : memref<1x128xf32, #tpu.memory_space<vmem>>, vector<1x128xf32>
      tpu.vector_store %arg11[%c0_25, %c0_26], %35 {strides = array<i32>} : memref<1x128xf32, #tpu.memory_space<vmem>>, vector<1x128xf32>,
      %c0_27 = arith.constant 0 : index
      %c0_28 = arith.constant 0 : index
      %37 = memref.load %arg7[%c0_27, %c0_28] : memref<1x1xf32, #tpu.memory_space<smem>>
      %38 = arith.mulf %22, %35 : vector<1x128xf32>
      %39 = vector.broadcast %37 : f32 to vector<1x128xf32>
      %40 = arith.subf %39, %38 : vector<1x128xf32>
      %c0_29 = arith.constant 0 : index
      %c0_30 = arith.constant 0 : index
      %41 = vector.load %arg12[%c0_29, %c0_30] : memref<1x128xf32, #tpu.memory_space<vmem>>, vector<1x128xf32>
      tpu.vector_store %arg12[%c0_29, %c0_30], %40 {strides = array<i32>} : memref<1x128xf32, #tpu.memory_space<vmem>>, vector<1x128xf32>,
      %c0_31 = arith.constant 0 : index
      %c0_32 = arith.constant 0 : index
      %42 = vector.load %arg1[%c0_31, %c0_32] : memref<4x1792xbf16, #tpu.memory_space<vmem>>, vector<4x1792xbf16>
      %c0_33 = arith.constant 0 : index
      %c0_34 = arith.constant 0 : index
      %43 = vector.load %arg2[%c0_33, %c0_34] : memref<1792x112xbf16, #tpu.memory_space<vmem>>, vector<1792x112xbf16>
      %cst_35 = arith.constant dense<0.000000e+00> : vector<4x112xf32>
      %44 = tpu.matmul %42, %43, %cst_35 {dimension_numbers = #tpu.dot_dimension_numbers<[1], [0], [0], [1], [0, 0, 1, 1], [], []>} : vector<4x1792xbf16>, vector<1792x112xbf16>, vector<4x112xf32> -> vector<4x112xf32>
      %cst_36 = arith.constant 0.000000e+00 : f32
      %45 = vector.broadcast %cst_36 : f32 to vector<4x112xf32>
      %46 = arith.maximumf %44, %45 : vector<4x112xf32>
      %47 = arith.truncf %46 : vector<4x112xf32> to vector<4x112xbf16>
      %c0_37 = arith.constant 0 : index
      %c0_38 = arith.constant 0 : index
      %48 = vector.load %arg3[%c0_37, %c0_38] : memref<112x128xbf16, #tpu.memory_space<vmem>>, vector<112x128xbf16>
      %cst_39 = arith.constant dense<0.000000e+00> : vector<4x128xf32>
      %49 = tpu.matmul %47, %48, %cst_39 {dimension_numbers = #tpu.dot_dimension_numbers<[1], [0], [0], [1], [0, 0, 1, 1], [], []>} : vector<4x112xbf16>, vector<112x128xbf16>, vector<4x128xf32> -> vector<4x128xf32>
      %cst_40 = arith.constant dense<0.000000e+00> : vector<128xf32>
      %50 = vector.multi_reduction <add>, %49, %cst_40 [0] : vector<4x128xf32> to vector<128xf32>
      %51 = vector.shape_cast %50 : vector<128xf32> to vector<1x128xf32>
      %cst_41 = arith.constant 4.000000e+00 : f32
      %52 = vector.broadcast %cst_41 : f32 to vector<1x128xf32>
      %53 = arith.divf %51, %52 : vector<1x128xf32>
      %54 = vector.broadcast %53 : vector<1x128xf32> to vector<4x128xf32>
      %55 = arith.subf %49, %54 : vector<4x128xf32>
      %56 = arith.mulf %55, %55 : vector<4x128xf32>
      %cst_42 = arith.constant dense<0.000000e+00> : vector<128xf32>
      %57 = vector.multi_reduction <add>, %56, %cst_42 [0] : vector<4x128xf32> to vector<128xf32>
      %58 = vector.shape_cast %57 : vector<128xf32> to vector<1x128xf32>
      %cst_43 = arith.constant 4.000000e+00 : f32
      %59 = vector.broadcast %cst_43 : f32 to vector<1x128xf32>
      %60 = arith.divf %58, %59 : vector<1x128xf32>
      %c0_44 = arith.constant 0 : index
      %c0_45 = arith.constant 0 : index
      %61 = vector.load %arg4[%c0_44, %c0_45] : memref<1x128xf32, #tpu.memory_space<vmem>>, vector<1x128xf32>
      %cst_46 = arith.constant 9.99999974E-6 : f32
      %62 = vector.broadcast %cst_46 : f32 to vector<1x128xf32>
      %63 = arith.addf %60, %62 : vector<1x128xf32>
      %64 = math.rsqrt %63 : vector<1x128xf32>
      %65 = arith.mulf %61, %64 : vector<1x128xf32>
      %66 = vector.broadcast %65 : vector<1x128xf32> to vector<4x128xf32>
      %67 = arith.mulf %49, %66 : vector<4x128xf32>
      %c0_47 = arith.constant 0 : index
      %c0_48 = arith.constant 0 : index
      %68 = vector.load %arg5[%c0_47, %c0_48] : memref<1x128xf32, #tpu.memory_space<vmem>>, vector<1x128xf32>
      %69 = arith.mulf %53, %65 : vector<1x128xf32>
      %70 = arith.subf %68, %69 : vector<1x128xf32>
      %71 = vector.broadcast %70 : vector<1x128xf32> to vector<4x128xf32>
      %72 = arith.addf %67, %71 : vector<4x128xf32>
      %cst_49 = arith.constant 0.000000e+00 : f32
      %73 = vector.broadcast %cst_49 : f32 to vector<4x128xf32>
      %74 = arith.subf %73, %72 : vector<4x128xf32>
      %75 = math.exp %74 : vector<4x128xf32>
      %cst_50 = arith.constant 1.000000e+00 : f32
      %76 = vector.broadcast %cst_50 : f32 to vector<4x128xf32>
      %77 = arith.addf %76, %75 : vector<4x128xf32>
      %cst_51 = arith.constant 1.000000e+00 : f32
      %78 = vector.broadcast %cst_51 : f32 to vector<4x128xf32>
      %79 = arith.divf %78, %77 : vector<4x128xf32>
      %c0_52 = arith.constant 0 : index
      %c0_53 = arith.constant 0 : index
      %80 = vector.load %arg10[%c0_52, %c0_53] : memref<4x128xf32, #tpu.memory_space<vmem>>, vector<4x128xf32>
      tpu.vector_store %arg10[%c0_52, %c0_53], %79 {strides = array<i32>} : memref<4x128xf32, #tpu.memory_space<vmem>>, vector<4x128xf32>,
    } else {
    }
    return
  }
  func.func @transform_0(%arg0: i32) -> (i32, i32) {
    %c0_i32 = arith.constant 0 : i32
    %c0_i32_0 = arith.constant 0 : i32
    %c0_i32_1 = arith.constant 0 : i32
    return %c0_i32, %c0_i32_0 : i32, i32
  }
  func.func @transform_1(%arg0: i32) -> (i32, i32) {
    %c0_i32 = arith.constant 0 : i32
    %c0_i32_0 = arith.constant 0 : i32
    %c0_i32_1 = arith.constant 0 : i32
    return %c0_i32, %c0_i32_0 : i32, i32
  }
  func.func @transform_2(%arg0: i32) -> (i32, i32) {
    %c0_i32 = arith.constant 0 : i32
    %c0_i32_0 = arith.constant 0 : i32
    %c0_i32_1 = arith.constant 0 : i32
    return %c0_i32, %c0_i32_0 : i32, i32
  }
  func.func @transform_3(%arg0: i32) -> (i32, i32) {
    %c0_i32 = arith.constant 0 : i32
    %c0_i32_0 = arith.constant 0 : i32
    %c0_i32_1 = arith.constant 0 : i32
    return %c0_i32, %c0_i32_0 : i32, i32
  }
  func.func @transform_4(%arg0: i32) -> (i32, i32) {
    %c0_i32 = arith.constant 0 : i32
    %c0_i32_0 = arith.constant 0 : i32
    %c0_i32_1 = arith.constant 0 : i32
    return %c0_i32, %c0_i32_0 : i32, i32
  }
  func.func @transform_5(%arg0: i32) -> (i32, i32) {
    %c0_i32 = arith.constant 0 : i32
    %c0_i32_0 = arith.constant 0 : i32
    %c0_i32_1 = arith.constant 0 : i32
    return %c0_i32, %c0_i32_0 : i32, i32
  }
  func.func @transform_6(%arg0: i32) -> (i32, i32) {
    %c0_i32 = arith.constant 0 : i32
    %c0_i32_0 = arith.constant 0 : i32
    %c0_i32_1 = arith.constant 0 : i32
    return %c0_i32, %c0_i32_0 : i32, i32
  }
  func.func @transform_7(%arg0: i32) -> (i32, i32) {
    %c0_i32 = arith.constant 0 : i32
    %c0_i32_0 = arith.constant 0 : i32
    return %arg0, %c0_i32 : i32, i32
  }
  func.func @transform_8(%arg0: i32) -> (i32, i32) {
    %c0_i32 = arith.constant 0 : i32
    %c0_i32_0 = arith.constant 0 : i32
    %c0_i32_1 = arith.constant 0 : i32
    return %c0_i32, %c0_i32_0 : i32, i32
  }
  func.func @transform_9(%arg0: i32) -> (i32, i32) {
    %c0_i32 = arith.constant 0 : i32
    %c0_i32_0 = arith.constant 0 : i32
    %c0_i32_1 = arith.constant 0 : i32
    return %c0_i32, %c0_i32_0 : i32, i32
  }
  func.func @transform_10(%arg0: i32) -> (i32, i32) {
    %c0_i32 = arith.constant 0 : i32
    %c0_i32_0 = arith.constant 0 : i32
    %c0_i32_1 = arith.constant 0 : i32
    return %c0_i32, %c0_i32_0 : i32, i32
  }
  func.func @transform_11(%arg0: i32) -> (i32, i32) {
    %c0_i32 = arith.constant 0 : i32
    %c0_i32_0 = arith.constant 0 : i32
    %c0_i32_1 = arith.constant 0 : i32
    return %c0_i32, %c0_i32_0 : i32, i32
  }
}

module attributes {stable_mosaic.version = 11 : i64} {
  func.func @_combine_kernel(%arg0: i32, %arg1: memref<1x1x128xf32, #tpu.memory_space<vmem>>, %arg2: memref<1x128xf32, #tpu.memory_space<vmem>>, %arg3: memref<1x128xf32, #tpu.memory_space<vmem>>, %arg4: memref<144x128xbf16, #tpu.memory_space<vmem>>, %arg5: memref<128x128xbf16, #tpu.memory_space<vmem>>, %arg6: memref<144x128xf32, #tpu.memory_space<vmem>>, %arg7: memref<144x128xf32, #tpu.memory_space<vmem>>, %arg8: memref<144x128xf32, #tpu.memory_space<vmem>>) attributes {dimension_semantics = [#tpu.dimension_semantics<parallel>], iteration_bounds = array<i64: 4>, scalar_prefetch = 0 : i64, scratch_operands = 0 : i64, tpu.core_type = #tpu.core_type<tc>, window_params = [{transform_indices = @transform_0, window_bounds = array<i64: 1, 1, 128>}, {pipeline_mode = #tpu.pipeline_mode<synchronous>, transform_indices = @transform_1, window_bounds = array<i64: 1, 128>}, {pipeline_mode = #tpu.pipeline_mode<synchronous>, transform_indices = @transform_2, window_bounds = array<i64: 1, 128>}, {transform_indices = @transform_3, window_bounds = array<i64: 144, 128>}, {pipeline_mode = #tpu.pipeline_mode<synchronous>, transform_indices = @transform_4, window_bounds = array<i64: 128, 128>}, {transform_indices = @transform_5, window_bounds = array<i64: 144, 128>}, {transform_indices = @transform_6, window_bounds = array<i64: 144, 128>}, {transform_indices = @transform_7, window_bounds = array<i64: 144, 128>}]} {
    %c0 = arith.constant 0 : index
    %c0_0 = arith.constant 0 : index
    %0 = vector.load %arg4[%c0, %c0_0] : memref<144x128xbf16, #tpu.memory_space<vmem>>, vector<144x128xbf16>
    %c0_1 = arith.constant 0 : index
    %c0_2 = arith.constant 0 : index
    %1 = vector.load %arg5[%c0_1, %c0_2] : memref<128x128xbf16, #tpu.memory_space<vmem>>, vector<128x128xbf16>
    %cst = arith.constant dense<0.000000e+00> : vector<144x128xf32>
    %2 = tpu.matmul %0, %1, %cst {dimension_numbers = #tpu.dot_dimension_numbers<[1], [0], [0], [1], [0, 0, 1, 1], [], []>} : vector<144x128xbf16>, vector<128x128xbf16>, vector<144x128xf32> -> vector<144x128xf32>
    %c0_3 = arith.constant 0 : index
    %c0_4 = arith.constant 0 : index
    %3 = vector.load %arg2[%c0_3, %c0_4] : memref<1x128xf32, #tpu.memory_space<vmem>>, vector<1x128xf32>
    %4 = vector.broadcast %3 : vector<1x128xf32> to vector<144x128xf32>
    %5 = arith.mulf %2, %4 : vector<144x128xf32>
    %c0_5 = arith.constant 0 : index
    %c0_6 = arith.constant 0 : index
    %6 = vector.load %arg3[%c0_5, %c0_6] : memref<1x128xf32, #tpu.memory_space<vmem>>, vector<1x128xf32>
    %7 = vector.broadcast %6 : vector<1x128xf32> to vector<144x128xf32>
    %8 = arith.addf %5, %7 : vector<144x128xf32>
    %cst_7 = arith.constant 0.000000e+00 : f32
    %9 = vector.broadcast %cst_7 : f32 to vector<144x128xf32>
    %10 = arith.subf %9, %8 : vector<144x128xf32>
    %11 = math.exp %10 : vector<144x128xf32>
    %cst_8 = arith.constant 1.000000e+00 : f32
    %12 = vector.broadcast %cst_8 : f32 to vector<144x128xf32>
    %13 = arith.addf %12, %11 : vector<144x128xf32>
    %cst_9 = arith.constant 1.000000e+00 : f32
    %14 = vector.broadcast %cst_9 : f32 to vector<144x128xf32>
    %15 = arith.divf %14, %13 : vector<144x128xf32>
    %c0_10 = arith.constant 0 : index
    %c0_11 = arith.constant 0 : index
    %c0_12 = arith.constant 0 : index
    %16 = vector.load %arg1[%c0_10, %c0_11, %c0_12] : memref<1x1x128xf32, #tpu.memory_space<vmem>>, vector<1x1x128xf32>
    %17 = vector.shape_cast %16 : vector<1x1x128xf32> to vector<1x128xf32>
    %18 = vector.broadcast %17 : vector<1x128xf32> to vector<144x128xf32>
    %19 = arith.addf %18, %15 : vector<144x128xf32>
    %cst_13 = arith.constant 5.000000e-01 : f32
    %20 = vector.broadcast %cst_13 : f32 to vector<144x128xf32>
    %21 = arith.mulf %20, %19 : vector<144x128xf32>
    %c0_14 = arith.constant 0 : index
    %c0_15 = arith.constant 0 : index
    %22 = vector.load %arg6[%c0_14, %c0_15] : memref<144x128xf32, #tpu.memory_space<vmem>>, vector<144x128xf32>
    %23 = arith.mulf %22, %21 : vector<144x128xf32>
    %c0_16 = arith.constant 0 : index
    %c0_17 = arith.constant 0 : index
    %24 = vector.load %arg8[%c0_16, %c0_17] : memref<144x128xf32, #tpu.memory_space<vmem>>, vector<144x128xf32>
    tpu.vector_store %arg8[%c0_16, %c0_17], %23 {strides = array<i32>} : memref<144x128xf32, #tpu.memory_space<vmem>>, vector<144x128xf32>,
    %25 = arith.subf %22, %23 : vector<144x128xf32>
    %c0_18 = arith.constant 0 : index
    %c0_19 = arith.constant 0 : index
    %26 = vector.load %arg7[%c0_18, %c0_19] : memref<144x128xf32, #tpu.memory_space<vmem>>, vector<144x128xf32>
    tpu.vector_store %arg7[%c0_18, %c0_19], %25 {strides = array<i32>} : memref<144x128xf32, #tpu.memory_space<vmem>>, vector<144x128xf32>,
    return
  }
  func.func @transform_0(%arg0: i32) -> (i32, i32, i32) {
    %c0_i32 = arith.constant 0 : i32
    %c0_i32_0 = arith.constant 0 : i32
    %c0_i32_1 = arith.constant 0 : i32
    return %arg0, %c0_i32, %c0_i32_0 : i32, i32, i32
  }
  func.func @transform_1(%arg0: i32) -> (i32, i32) {
    %c0_i32 = arith.constant 0 : i32
    %c0_i32_0 = arith.constant 0 : i32
    %c0_i32_1 = arith.constant 0 : i32
    return %c0_i32, %c0_i32_0 : i32, i32
  }
  func.func @transform_2(%arg0: i32) -> (i32, i32) {
    %c0_i32 = arith.constant 0 : i32
    %c0_i32_0 = arith.constant 0 : i32
    %c0_i32_1 = arith.constant 0 : i32
    return %c0_i32, %c0_i32_0 : i32, i32
  }
  func.func @transform_3(%arg0: i32) -> (i32, i32) {
    %c0_i32 = arith.constant 0 : i32
    %c0_i32_0 = arith.constant 0 : i32
    return %arg0, %c0_i32 : i32, i32
  }
  func.func @transform_4(%arg0: i32) -> (i32, i32) {
    %c0_i32 = arith.constant 0 : i32
    %c0_i32_0 = arith.constant 0 : i32
    %c0_i32_1 = arith.constant 0 : i32
    return %c0_i32, %c0_i32_0 : i32, i32
  }
  func.func @transform_5(%arg0: i32) -> (i32, i32) {
    %c0_i32 = arith.constant 0 : i32
    %c0_i32_0 = arith.constant 0 : i32
    return %arg0, %c0_i32 : i32, i32
  }
  func.func @transform_6(%arg0: i32) -> (i32, i32) {
    %c0_i32 = arith.constant 0 : i32
    %c0_i32_0 = arith.constant 0 : i32
    return %arg0, %c0_i32 : i32, i32
  }
  func.func @transform_7(%arg0: i32) -> (i32, i32) {
    %c0_i32 = arith.constant 0 : i32
    %c0_i32_0 = arith.constant 0 : i32
    return %arg0, %c0_i32 : i32, i32
  }
}

</mosaic_0001>

<bundles_post_ra>
// kernel: _lambda_.2
= control target key start
LH: loop header
LB: loop body
LE: loop exit
PB: predicated region body
PF: predicated region fallthrough
CT: control target
= control target key end

     0   :  { %s2783_s21 = smov 0   ;;  %s3243_s0 = inlined_call_operand.vmem [shape: bf16[4,1792], index: 0, kind: input, shape index: {}]   ;;  %s3244_s1 = inlined_call_operand.vmem [shape: bf16[1792,112], index: 1, kind: input, shape index: {}]   ;;  %s3245_s2 = inlined_call_operand.vmem [shape: bf16[112,128], index: 2, kind: input, shape index: {}]   ;;  %s3246_s3 = inlined_call_operand.vmem [shape: f32[1,128], index: 3, kind: input, shape index: {}]   ;;  %s3247_s4 = inlined_call_operand.vmem [shape: f32[1,128], index: 4, kind: input, shape index: {}]   ;;  %s3248_s5 = inlined_call_operand.<no memory space> [shape: f32[1,1], index: 5, kind: input, shape index: {}]   ;;  %s3249_s6 = inlined_call_operand.<no memory space> [shape: f32[1,1], index: 6, kind: input, shape index: {}]   ;;  %s3250_s7 = inlined_call_operand.vmem [shape: bf16[576,128], index: 7, kind: input, shape index: {}]   ;;  %s3251_s8 = inlined_call_operand.vmem [shape: bf16[128,128], index: 8, kind: input, shape index: {}]   ;;  %s3252_s9 = inlined_call_operand.vmem [shape: f32[4,128], index: 9, kind: output, shape index: {0}]   ;;  %s3253_s10 = inlined_call_operand.vmem [shape: f32[1,128], index: 10, kind: output, shape index: {1}]   ;;  %s3254_s11 = inlined_call_operand.vmem [shape: f32[1,128], index: 11, kind: output, shape index: {2}]  }
   0x1   :  { %17 = sst [smem:[#allocation4]] %s3248_s5 }
   0x2   :  { %18 = sst [smem:[#allocation5]] %s3249_s6 }
   0x3 LB: > { %s2789_s22 = sadd.s32 4294967295, %s2713_s21   ;;  %p1976_p0 = scmp.ge.s32.totalorder %s2713_s21, 1  ;;  %s2713_s21 = sphi %s2783_s21, %s24_s21  }
   0x4   : > { %p330_p1 = scmp.lt.s32.totalorder %s2713_s21, 5 }
   0x6   : > { %p331_p2 = pnand %p1976_p0, %p330_p1 }
   0x7   : > { %s365_s5 = smul.u32 (!%p331_p2), 18, %s2789_s22  ;;  %p1978_p4 = scmp.ne.s32.totalorder (!%p331_p2), %s2789_s22, 0 }
   0x8   : > { %334 = sbr.rel (%p331_p2) target bundleno = 741 (0x2e5), region = 56 }
   0x9   : > { %p366_p3 = scmp.lt.s32.totalorder (!%p331_p2), %s365_s5, 71 }
   0xd   : > { %s3258_s5 = smov (!%p366_p3, %s365_s5), 71  ;;  %375 = sbr.rel (%p1978_p4) target bundleno = 21 (0x15), region = 60 }
   0xe   : > { %s1977_s6 = sshll.u32 %s3258_s5, 2 }
   0xf   : > { %s2797_s25 = scalar_lea.vmem %s3250_s7, %s1977_s6 }
  0x12   : > { %v2715_v0 = vmov 0.0  }
  0x13   : > { %376 = vst [vmem:[#allocation2] sm:$0x1] %v2715_v0 }
  0x14   : > { %377 = vst [vmem:[#allocation3] sm:$0x1] %v2715_v0 }
  0x15 PF: > { %v2543_v1 = vld [vmem:[%s3251_s8 + $0x38] sm:$0xff]  ;;  %v2542_v2 = vld [vmem:[%s3251_s8 + $0x30] sm:$0xff]  ;;  %v2541_v3 = vld [vmem:[%s3251_s8 + $0x28] sm:$0xff]  ;;  %p2047_p5 = scmp.ne.s32.totalorder %s2789_s22, 3 }
  0x16   : > { %514 = vmatpush.bf16.msra.mxu0 %v2543_v1  ;;  %2664 = vmatpush.bf16.msra.mxu2 %v2543_v1  ;;  %v2540_v4 = vld [vmem:[%s3251_s8 + $0x20] sm:$0xff]  ;;  %v2539_v5 = vld [vmem:[%s3251_s8 + $0x18] sm:$0xff]  ;;  %v2538_v6 = vld [vmem:[%s3251_s8 + $0x10] sm:$0xff]  ;;  %s2898_s23 = sld [smem:[#allocation4]] (!%p2047_p5) }
  0x17   : > { %2663 = vmatpush.bf16.msra.mxu1 %v2543_v1  ;;  %2665 = vmatpush.bf16.msra.mxu3 %v2543_v1  ;;  %v2537_v7 = vld [vmem:[%s3251_s8 + $0x8] sm:$0xff]  ;;  %v2536_v8 = vld [vmem:[%s3251_s8] sm:$0xff]  ;;  %v2529_v11 = vld [vmem:[%s2797_s25 + $0x10] sm:$0xff]  ;;  %s2915_s14 = sld [smem:[#allocation5]] (!%p2047_p5) }
  0x18   : > { %v2527_v9 = vld [vmem:[%s2797_s25] sm:$0xff]  ;;  %v2534_v12 = vld [vmem:[%s2797_s25 + $0x38] sm:$0xff]  ;;  %v2528_v13 = vld [vmem:[%s2797_s25 + $0x8] sm:$0xff] }
  0x19   : > { %v2531_v10 = vld [vmem:[%s2797_s25 + $0x20] sm:$0xff]  ;;  %v2532_v14 = vld [vmem:[%s2797_s25 + $0x28] sm:$0xff]  ;;  %v2530_v15 = vld [vmem:[%s2797_s25 + $0x18] sm:$0xff] }
  0x1a   : > { %515 = vmatpush.bf16.msra.mxu0 %v2542_v2  ;;  %2667 = vmatpush.bf16.msra.mxu2 %v2542_v2  ;;  %v2535_v16 = vld [vmem:[%s2797_s25 + $0x40] sm:$0xff]  ;;  %v2533_v17 = vld [vmem:[%s2797_s25 + $0x30] sm:$0xff] }
  0x1b   : > { %2666 = vmatpush.bf16.msra.mxu1 %v2542_v2  ;;  %2668 = vmatpush.bf16.msra.mxu3 %v2542_v2 }
  0x1e   : > { %516 = vmatpush.bf16.msra.mxu0 %v2541_v3  ;;  %2670 = vmatpush.bf16.msra.mxu2 %v2541_v3 }
  0x1f   : > { %2669 = vmatpush.bf16.msra.mxu1 %v2541_v3  ;;  %2671 = vmatpush.bf16.msra.mxu3 %v2541_v3 }
  0x22   : > { %517 = vmatpush.bf16.msra.mxu0 %v2540_v4  ;;  %2673 = vmatpush.bf16.msra.mxu2 %v2540_v4 }
  0x23   : > { %2672 = vmatpush.bf16.msra.mxu1 %v2540_v4  ;;  %2674 = vmatpush.bf16.msra.mxu3 %v2540_v4 }
  0x26   : > { %518 = vmatpush.bf16.msra.mxu0 %v2539_v5  ;;  %2676 = vmatpush.bf16.msra.mxu2 %v2539_v5 }
  0x27   : > { %2675 = vmatpush.bf16.msra.mxu1 %v2539_v5  ;;  %2677 = vmatpush.bf16.msra.mxu3 %v2539_v5 }
  0x2a   : > { %519 = vmatpush.bf16.msra.mxu0 %v2538_v6  ;;  %2679 = vmatpush.bf16.msra.mxu2 %v2538_v6 }
  0x2b   : > { %2678 = vmatpush.bf16.msra.mxu1 %v2538_v6  ;;  %2680 = vmatpush.bf16.msra.mxu3 %v2538_v6 }
  0x2e   : > { %520 = vmatpush.bf16.msra.mxu0 %v2537_v7  ;;  %2682 = vmatpush.bf16.msra.mxu2 %v2537_v7 }
  0x2f   : > { %2681 = vmatpush.bf16.msra.mxu1 %v2537_v7  ;;  %2683 = vmatpush.bf16.msra.mxu3 %v2537_v7 }
  0x32   : > { %521 = vmatpush.bf16.msra.mxu0 %v2536_v8  ;;  %2685 = vmatpush.bf16.msra.mxu2 %v2536_v8 }
  0x33   : > { %2684 = vmatpush.bf16.msra.mxu1 %v2536_v8  ;;  %2686 = vmatpush.bf16.msra.mxu3 %v2536_v8 }
  0x35   : > { %522 = vmatmul.bf16.vlgmr.msra.gmra.mxu0 %v2527_v9  ;;  %542 = vmatmul.bf16.vlgmr.msra.gmra.mxu2 %v2531_v10 }
  0x36   : > { %532 = vmatmul.bf16.vlgmr.msra.gmra.mxu1 %v2529_v11  ;;  %557 = vmatmul.bf16.vlgmr.msra.gmra.mxu3 %v2534_v12 }
  0x45   : > { %527 = vmatmul.bf16.gmra.mxu0 %v2528_v13  ;;  %547 = vmatmul.bf16.gmra.mxu2 %v2532_v14 }
  0x46   : > { %537 = vmatmul.bf16.gmra.mxu1 %v2530_v15  ;;  %562 = vmatmul.bf16.gmra.mxu3 %v2535_v16 }
  0x55   : > { %552 = vmatmul.bf16.gmra.mxu2 %v2533_v17 }
  0xb2   : > { %v523_v18 = vpop.f32.mrf.mxu0 }
  0xb3   : > { %v533_v19 = vpop.f32.mrf.mxu1  ;;  %v595_v27 = vmul.f32 %v523_v18, %v523_v18 }
  0xb4   : > { %v599_v38 = vmul.f32 %v533_v19, %v533_v19 }
  0xb8   : > { %v543_v20 = vpop.f32.mrf.mxu2 }
  0xb9   : > { %v558_v31 = vpop.f32.mrf.mxu3  ;;  %v603_v53 = vmul.f32 %v543_v20, %v543_v20 }
  0xba   : > { %v525_v21 = vpop.f32.mrf.mxu0  ;;  %v609_v10 = vmul.f32 %v558_v31, %v558_v31 }
  0xbb   : > { %v535_v22 = vpop.f32.mrf.mxu1  ;;  %v596_v25 = vmul.f32 %v525_v21, %v525_v21  ;;  %v569_v28 = vadd.f32 %v525_v21, %v523_v18 }
  0xbc   : > { %v600_v41 = vmul.f32 %v535_v22, %v535_v22 }
  0xbd   : > { %v613_v32 = vadd.f32 %v596_v25, %v595_v27 }
  0xc0   : > { %v545_v23 = vpop.f32.mrf.mxu2 }
  0xc1   : > { %v560_v49 = vpop.f32.mrf.mxu3  ;;  %v604_v56 = vmul.f32 %v545_v23, %v545_v23 }
  0xc2   : > { %v528_v24 = vpop.f32.mrf.mxu0  ;;  %v610_v13 = vmul.f32 %v560_v49, %v560_v49 }
  0xc3   : > { %v538_v26 = vpop.f32.mrf.mxu1  ;;  %v597_v29 = vmul.f32 %v528_v24, %v528_v24  ;;  %v570_v33 = vadd.f32 %v569_v28, %v528_v24 }
  0xc4   : > { %v601_v46 = vmul.f32 %v538_v26, %v538_v26 }
  0xc5   : > { %v614_v35 = vadd.f32 %v613_v32, %v597_v29 }
  0xc8   : > { %v548_v30 = vpop.f32.mrf.mxu2 }
  0xc9   : > { %v605_v60 = vmul.f32 %v548_v30, %v548_v30  ;;  %v563_v2 = vpop.f32.mrf.mxu3 }
  0xca   : > { %v530_v34 = vpop.f32.mrf.mxu0  ;;  %v611_v17 = vmul.f32 %v563_v2, %v563_v2 }
  0xcb   : > { %v571_v36 = vadd.f32 %v570_v33, %v530_v34  ;;  %v598_v37 = vmul.f32 %v530_v34, %v530_v34  ;;  %v540_v44 = vpop.f32.mrf.mxu1  ;;  %v568_v33 = vld [vmem:[#allocation2] sm:$0x1] }
  0xcc   : > { %v602_v51 = vmul.f32 %v540_v44, %v540_v44 }
  0xcd   : > { %v572_v39 = vadd.f32 %v571_v36, %v533_v19  ;;  %v615_v40 = vadd.f32 %v614_v35, %v598_v37  ;;  %v594_v36 = vld [vmem:[#allocation3] sm:$0x1] }
  0xcf   : > { %v616_v42 = vadd.f32 %v615_v40, %v599_v38  ;;  %v573_v43 = vadd.f32 %v572_v39, %v535_v22 }
  0xd0   : > { %v550_v45 = vpop.f32.mrf.mxu2 }
  0xd1   : > { %v574_v47 = vadd.f32 %v573_v43, %v538_v26  ;;  %v617_v48 = vadd.f32 %v616_v42, %v600_v41  ;;  %v606_v0 = vmul.f32 %v550_v45, %v550_v45  ;;  %v565_v16 = vpop.f32.mrf.mxu3 }
  0xd2   : > { %v612_v21 = vmul.f32 %v565_v16, %v565_v16 }
  0xd3   : > { %v575_v50 = vadd.f32 %v574_v47, %v540_v44  ;;  %v618_v52 = vadd.f32 %v617_v48, %v601_v46 }
  0xd5   : > { %v576_v54 = vadd.f32 %v575_v50, %v543_v20  ;;  %v619_v55 = vadd.f32 %v618_v52, %v602_v51 }
  0xd7   : > { %v577_v57 = vadd.f32 %v576_v54, %v545_v23  ;;  %v620_v58 = vadd.f32 %v619_v55, %v603_v53 }
  0xd8   : > { %v553_v59 = vpop.f32.mrf.mxu2 }
  0xd9   : > { %v621_v61 = vadd.f32 %v620_v58, %v604_v56  ;;  %v578_v62 = vadd.f32 %v577_v57, %v548_v30  ;;  %v607_v5 = vmul.f32 %v553_v59, %v553_v59 }
  0xdb   : > { %v579_v63 = vadd.f32 %v578_v62, %v550_v45  ;;  %v622_v1 = vadd.f32 %v621_v61, %v605_v60 }
  0xdd   : > { %v623_v3 = vadd.f32 %v622_v1, %v606_v0  ;;  %v580_v4 = vadd.f32 %v579_v63, %v553_v59 }
  0xdf   : > { %v624_v7 = vadd.f32 %v623_v3, %v607_v5 }
  0xe0   : > { %v555_v6 = vpop.f32.mrf.mxu2 }
  0xe1   : > { %v581_v8 = vadd.f32 %v580_v4, %v555_v6  ;;  %v608_v9 = vmul.f32 %v555_v6, %v555_v6 }
  0xe3   : > { %v582_v11 = vadd.f32 %v581_v8, %v558_v31  ;;  %v625_v12 = vadd.f32 %v624_v7, %v608_v9 }
  0xe5   : > { %v626_v14 = vadd.f32 %v625_v12, %v609_v10  ;;  %v583_v15 = vadd.f32 %v582_v11, %v560_v49 }
  0xe7   : > { %v584_v18 = vadd.f32 %v583_v15, %v563_v2  ;;  %v627_v19 = vadd.f32 %v626_v14, %v610_v13 }
  0xe9   : > { %v585_v20 = vadd.f32 %v584_v18, %v565_v16  ;;  %v628_v22 = vadd.f32 %v627_v19, %v611_v17 }
  0xeb   : > { %v586_v23 = vrot.slane %v585_v20, 4  ;;  %v629_v24 = vadd.f32 %v628_v22, %v612_v21 }
  0xed   : > { %v587_v25 = vadd.f32 %v586_v23, %v585_v20  ;;  %v630_v26 = vrot.slane %v629_v24, 4 }
  0xef   : > { %v588_v27 = vrot.slane %v587_v25, 2  ;;  %v631_v28 = vadd.f32 %v630_v26, %v629_v24 }
  0xf1   : > { %v589_v29 = vadd.f32 %v588_v27, %v587_v25  ;;  %v632_v30 = vrot.slane %v631_v28, 2 }
  0xf3   : > { %v590_v31 = vrot.slane %v589_v29, 1  ;;  %v633_v32 = vadd.f32 %v632_v30, %v631_v28 }
  0xf5   : > { %v591_v34 = vadd.f32 %v590_v31, %v589_v29  ;;  %v634_v35 = vrot.slane %v633_v32, 1 }
  0xf7   : > { %v592_v37 = vadd.f32 %v591_v34, %v568_v33  ;;  %v635_v38 = vadd.f32 %v634_v35, %v633_v32  ;;  %641 = sbr.rel (%p2047_p5) target bundleno = 741 (0x2e5), region = 64 }
  0xf9   : > { %593 = vst [vmem:[#allocation2] sm:$0x1] %v592_v37  ;;  %v636_v39 = vadd.f32 %v635_v38, %v594_v36 }
  0xfb   : > { %637 = vst [vmem:[#allocation3] sm:$0x1] %v636_v39 }
  0xfc   : > { %v2551_v44 = vld [vmem:[%s3244_s1 + $0x38] sm:$0xff]  ;;  %v2550_v49 = vld [vmem:[%s3244_s1 + $0x30] sm:$0xff]  ;;  %v2549_v55 = vld [vmem:[%s3244_s1 + $0x28] sm:$0xff]  ;;  %v661_v20 = vstv %s2898_s23  ;;  %vm1846_vm3 = vcmask 916480   ;;  %vm1863_vm4 = vcmask 1043456  }
  0xfd   : > { %v2559_v45 = vld [vmem:[%s3244_s1 + $0x78] sm:$0xff]  ;;  %1606 = vmatpush.bf16.msra.mxu0 %v2551_v44  ;;  %v2558_v50 = vld [vmem:[%s3244_s1 + $0x70] sm:$0xff]  ;;  %v2557_v56 = vld [vmem:[%s3244_s1 + $0x68] sm:$0xff]  ;;  %v666_v32 = vstv %s2915_s14 }
  0xfe   : > { %v2567_v46 = vld [vmem:[%s3244_s1 + $0xb8] sm:$0xff]  ;;  %1619 = vmatpush.bf16.msra.mxu1 %v2559_v45  ;;  %v2566_v52 = vld [vmem:[%s3244_s1 + $0xb0] sm:$0xff]  ;;  %v2565_v58 = vld [vmem:[%s3244_s1 + $0xa8] sm:$0xff] }
  0xff   : > { %v2575_v48 = vld [vmem:[%s3244_s1 + $0xf8] sm:$0xff]  ;;  %1632 = vmatpush.bf16.msra.mxu2 %v2567_v46  ;;  %v2574_v53 = vld [vmem:[%s3244_s1 + $0xf0] sm:$0xff]  ;;  %v2573_v59 = vld [vmem:[%s3244_s1 + $0xe8] sm:$0xff] }
 0x100   : > { %v642_v40 = vld [vmem:[#allocation2] sm:$0x1]  ;;  %1645 = vmatpush.bf16.msra.mxu3 %v2575_v48  ;;  %v2548_v60 = vld [vmem:[%s3244_s1 + $0x20] sm:$0xff]  ;;  %v2547_v0 = vld [vmem:[%s3244_s1 + $0x18] sm:$0xff] }
 0x101   : > { %v2834_v42 = vmul.f32 0.0017361111, %v642_v40  ;;  %1607 = vmatpush.bf16.msra.mxu0 %v2550_v49  ;;  %v2556_v61 = vld [vmem:[%s3244_s1 + $0x60] sm:$0xff]  ;;  %v2555_v1 = vld [vmem:[%s3244_s1 + $0x58] sm:$0xff]  ;;  %v2546_v8 = vld [vmem:[%s3244_s1 + $0x10] sm:$0xff] }
 0x102   : > { %v644_v41 = vld [vmem:[#allocation3] sm:$0x1]  ;;  %1620 = vmatpush.bf16.msra.mxu1 %v2558_v50  ;;  %v2564_v62 = vld [vmem:[%s3244_s1 + $0xa0] sm:$0xff]  ;;  %v2563_v3 = vld [vmem:[%s3244_s1 + $0x98] sm:$0xff] }
 0x103   : > { %v645_v43 = vmul.f32 0.0017361111, %v644_v41  ;;  %v646_v47 = vmul.f32 %v2834_v42, %v2834_v42  ;;  %1633 = vmatpush.bf16.msra.mxu2 %v2566_v52  ;;  %v2572_v63 = vld [vmem:[%s3244_s1 + $0xe0] sm:$0xff]  ;;  %v2571_v4 = vld [vmem:[%s3244_s1 + $0xd8] sm:$0xff]  ;;  %v2554_v9 = vld [vmem:[%s3244_s1 + $0x50] sm:$0xff] }
 0x104   : > { %1646 = vmatpush.bf16.msra.mxu3 %v2574_v53  ;;  %v669_v6 = vld [vmem:[%s3243_s0] sm:$0xff]  ;;  %v2562_v10 = vld [vmem:[%s3244_s1 + $0x90] sm:$0xff]  ;;  %v2545_v14 = vld [vmem:[%s3244_s1 + $0x8] sm:$0xff] }
 0x105   : > { %v647_v51 = vsub.f32 %v645_v43, %v646_v47  ;;  %1608 = vmatpush.bf16.msra.mxu0 %v2549_v55  ;;  %898 = vst [vmem:[#allocation1] ss:$4 sm:$0xff] %v669_v6  ;;  %v2570_v11 = vld [vmem:[%s3244_s1 + $0xd0] sm:$0xff]  ;;  %v2553_v15 = vld [vmem:[%s3244_s1 + $0x48] sm:$0xff]  ;;  %v2544_v21 = vld [vmem:[%s3244_s1] sm:$0xff] }
 0x106   : > { %1621 = vmatpush.bf16.msra.mxu1 %v2557_v56  ;;  %v2561_v17 = vld [vmem:[%s3244_s1 + $0x88] sm:$0xff]  ;;  %v2552_v22 = vld [vmem:[%s3244_s1 + $0x40] sm:$0xff]  ;;  %v671_v23 = vld [vmem:[%s3243_s0 + $0x10] sm:$0xff] }
 0x107   : > { %v648_v54 = vmax.f32 %v647_v51, 0.0  ;;  %1634 = vmatpush.bf16.msra.mxu2 %v2565_v58  ;;  %v2569_v18 = vld [vmem:[%s3244_s1 + $0xc8] sm:$0xff]  ;;  %v2560_v30 = vld [vmem:[%s3244_s1 + $0x80] sm:$0xff]  ;;  %v2583_v31 = vld [vmem:[%s3244_s1 + $0x138] sm:$0xff] }
 0x108   : > { %1647 = vmatpush.bf16.msra.mxu3 %v2573_v59  ;;  %v2591_v33 = vld [vmem:[%s3244_s1 + $0x178] sm:$0xff]  ;;  %v2568_v36 = vld [vmem:[%s3244_s1 + $0xc0] sm:$0xff]  ;;  %v670_v37 = vld [vmem:[%s3243_s0 + $0x8] sm:$0xff] }
 0x109   : > { %v650_v57 = vadd.f32 1e-05, %v648_v54  ;;  %1609 = vmatpush.bf16.msra.mxu0 %v2548_v60  ;;  %v2599_v34 = vld [vmem:[%s3244_s1 + $0x1b8] sm:$0xff]  ;;  %901 = vst [vmem:[#allocation1 + $0x20] ss:$4 sm:$0xff] %v670_v37  ;;  %v2582_v40 = vld [vmem:[%s3244_s1 + $0x130] sm:$0xff] }
 0x10a   : > { %1622 = vmatpush.bf16.msra.mxu1 %v2556_v61  ;;  %v2607_v38 = vld [vmem:[%s3244_s1 + $0x1f8] sm:$0xff]  ;;  %v2590_v41 = vld [vmem:[%s3244_s1 + $0x170] sm:$0xff]  ;;  %v2581_v44 = vld [vmem:[%s3244_s1 + $0x128] sm:$0xff] }
 0x10b   : > { %2697 = vrsqrt.f32 %v650_v57  ;;  %1635 = vmatpush.bf16.msra.mxu2 %v2564_v62  ;;  %vm657_vm0 = vweird.f32 %v650_v57  ;;  %v2606_v43 = vld [vmem:[%s3244_s1 + $0x1f0] sm:$0xff]  ;;  %v2589_v45 = vld [vmem:[%s3244_s1 + $0x168] sm:$0xff]  ;;  %v672_v48 = vld [vmem:[%s3243_s0 + $0x18] sm:$0xf] }
 0x10c   : > { %1648 = vmatpush.bf16.msra.mxu3 %v2572_v63  ;;  %v904_v24 = vld.sshfl [vmem:[#allocation1 + $0x10] sm:$0xff pattern:$0x73625140]  ;;  %v902_v25 = vld.sshfl [vmem:[#allocation1] sm:$0xff pattern:$0x73625140] }
 0x10d   : > { %1610 = vmatpush.bf16.msra.mxu0 %v2547_v0  ;;  %v905_v27 = vld.sshfl [vmem:[#allocation1 + $0x18] sm:$0xff pattern:$0x73625140]  ;;  %v903_v28 = vld.sshfl [vmem:[#allocation1 + $0x8] sm:$0xff pattern:$0x73625140] }
 0x10e   : > { %1623 = vmatpush.bf16.msra.mxu1 %v2555_v1  ;;  %911 = vst [vmem:[#allocation1] ss:$4 sm:$0xff] %v671_v23  ;;  %v2597_v46 = vld [vmem:[%s3244_s1 + $0x1a8] sm:$0xff]  ;;  %v2580_v53 = vld [vmem:[%s3244_s1 + $0x120] sm:$0xff]  ;;  %v2587_v58 = vld [vmem:[%s3244_s1 + $0x158] sm:$0xff] }
 0x10f   : > { %1636 = vmatpush.bf16.msra.mxu2 %v2563_v3  ;;  %v2605_v47 = vld [vmem:[%s3244_s1 + $0x1e8] sm:$0xff]  ;;  %v2588_v54 = vld [vmem:[%s3244_s1 + $0x160] sm:$0xff]  ;;  %v2595_v59 = vld [vmem:[%s3244_s1 + $0x198] sm:$0xff] }
 0x110   : > { %1649 = vmatpush.bf16.msra.mxu3 %v2571_v4  ;;  %v908_v49 = vld.sshfl [vmem:[#allocation1 + $0x30] sm:$0xff pattern:$0x73625140]  ;;  %v906_v50 = vld.sshfl [vmem:[#allocation1 + $0x20] sm:$0xff pattern:$0x73625140] }
 0x111   : > { %v2698_v2 = vpop.eup %2697  ;;  %1611 = vmatpush.bf16.msra.mxu0 %v2546_v8  ;;  %v3001_v51 = vld.sshfl [vmem:[#allocation1 + $0x38] sm:$0xff pattern:$0x73625140]  ;;  %v907_v52 = vld.sshfl [vmem:[#allocation1 + $0x28] sm:$0xff pattern:$0x73625140] }
 0x112   : > { %v652_v5 = vmul.f32 %v2698_v2, %v650_v57  ;;  %vm658_vm1 = vweird.f32 %v2698_v2  ;;  %1624 = vmatpush.bf16.msra.mxu1 %v2554_v9  ;;  %913 = vst [vmem:[#allocation1 + $0x20] ss:$4 sm:$0xff] %v672_v48  ;;  %v2596_v55 = vld [vmem:[%s3244_s1 + $0x1a0] sm:$0xff]  ;;  %v2579_v57 = vld [vmem:[%s3244_s1 + $0x118] sm:$0xff]  ;;  %v2578_v61 = vld [vmem:[%s3244_s1 + $0x110] sm:$0xff] }
 0x113   : > { %vm2923_vm2 = vmor %vm657_vm0, %vm658_vm1  ;;  %1637 = vmatpush.bf16.msra.mxu2 %v2562_v10  ;;  %v2604_v56 = vld [vmem:[%s3244_s1 + $0x1e0] sm:$0xff]  ;;  %v2603_v60 = vld [vmem:[%s3244_s1 + $0x1d8] sm:$0xff] }
 0x114   : > { %v653_v7 = vmul.f32 %v2698_v2, %v652_v5  ;;  %1650 = vmatpush.bf16.msra.mxu3 %v2570_v11  ;;  %v2586_v62 = vld [vmem:[%s3244_s1 + $0x150] sm:$0xff]  ;;  %v2577_v1 = vld [vmem:[%s3244_s1 + $0x108] sm:$0xff]  ;;  %v2576_v5 = vld [vmem:[%s3244_s1 + $0x100] sm:$0xff] }
 0x115   : > { %1612 = vmatpush.bf16.msra.mxu0 %v2545_v14  ;;  %v2594_v63 = vld [vmem:[%s3244_s1 + $0x190] sm:$0xff]  ;;  %v2593_v3 = vld [vmem:[%s3244_s1 + $0x188] sm:$0xff]  ;;  %v2584_v6 = vld [vmem:[%s3244_s1 + $0x140] sm:$0xff] }
 0x116   : > { %v654_v12 = vmul.f32 0.5, %v653_v7  ;;  %1625 = vmatpush.bf16.msra.mxu1 %v2553_v15  ;;  %v2602_v0 = vld [vmem:[%s3244_s1 + $0x1d0] sm:$0xff]  ;;  %v2601_v4 = vld [vmem:[%s3244_s1 + $0x1c8] sm:$0xff]  ;;  %v2592_v7 = vld [vmem:[%s3244_s1 + $0x180] sm:$0xff] }
 0x117   : > { %1638 = vmatpush.bf16.msra.mxu2 %v2561_v17  ;;  %v2615_v8 = vld [vmem:[%s3244_s1 + $0x238] sm:$0xff]  ;;  %v2600_v11 = vld [vmem:[%s3244_s1 + $0x1c0] sm:$0xff]  ;;  %v2622_v14 = vld [vmem:[%s3244_s1 + $0x270] sm:$0xff] }
 0x118   : > { %v655_v13 = vsub.f32 1.5, %v654_v12  ;;  %1651 = vmatpush.bf16.msra.mxu3 %v2569_v18  ;;  %v2623_v9 = vld [vmem:[%s3244_s1 + $0x278] sm:$0xff]  ;;  %v2630_v15 = vld [vmem:[%s3244_s1 + $0x2b0] sm:$0xff]  ;;  %v2613_v17 = vld [vmem:[%s3244_s1 + $0x228] sm:$0xff] }
 0x119   : > { %1613 = vmatpush.bf16.msra.mxu0 %v2544_v21  ;;  %v2631_v10 = vld [vmem:[%s3244_s1 + $0x2b8] sm:$0xff]  ;;  %v2638_v16 = vld [vmem:[%s3244_s1 + $0x2f0] sm:$0xff]  ;;  %v2621_v18 = vld [vmem:[%s3244_s1 + $0x268] sm:$0xff] }
 0x11a   : > { %v656_v19 = vmul.f32 %v2698_v2, %v655_v13  ;;  %1626 = vmatpush.bf16.msra.mxu1 %v2552_v22  ;;  %v2639_v12 = vld [vmem:[%s3244_s1 + $0x2f8] sm:$0xff]  ;;  %v2614_v13 = vld [vmem:[%s3244_s1 + $0x230] sm:$0xff]  ;;  %v2612_v21 = vld [vmem:[%s3244_s1 + $0x220] sm:$0xff] }
 0x11b   : > { %1639 = vmatpush.bf16.msra.mxu2 %v2560_v30  ;;  %v2620_v22 = vld [vmem:[%s3244_s1 + $0x260] sm:$0xff]  ;;  %v2618_v30 = vld [vmem:[%s3244_s1 + $0x250] sm:$0xff] }
 0x11c   : > { %v660_v26 = vsel %vm2923_vm2, %v2698_v2, %v656_v19  ;;  %1652 = vmatpush.bf16.msra.mxu3 %v2568_v36  ;;  %1614 = vmatmul.bf16.vlgmr.msra.gmra.mxu0 %v902_v25  ;;  %v2585_v2 = vld [vmem:[%s3244_s1 + $0x148] sm:$0xff]  ;;  %v2628_v23 = vld [vmem:[%s3244_s1 + $0x2a0] sm:$0xff]  ;;  %v2611_v25 = vld [vmem:[%s3244_s1 + $0x218] sm:$0xff] }
 0x11d   : > { %v662_v29 = vmul.f32 %v661_v20, %v660_v26  ;;  %1658 = vmatpush.bf16.msrb.mxu0 %v2583_v31  ;;  %1627 = vmatmul.bf16.vlgmr.msra.gmra.mxu1 %v903_v28  ;;  %v2629_v19 = vld [vmem:[%s3244_s1 + $0x2a8] sm:$0xff]  ;;  %v2619_v26 = vld [vmem:[%s3244_s1 + $0x258] sm:$0xff]  ;;  %v2626_v31 = vld [vmem:[%s3244_s1 + $0x290] sm:$0xff] }
 0x11e   : > { %1671 = vmatpush.bf16.msrb.mxu1 %v2591_v33  ;;  %1640 = vmatmul.bf16.vlgmr.msra.gmra.mxu2 %v904_v24  ;;  %v2637_v20 = vld [vmem:[%s3244_s1 + $0x2e8] sm:$0xff]  ;;  %v2636_v24 = vld [vmem:[%s3244_s1 + $0x2e0] sm:$0xff]  ;;  %v2635_v28 = vld [vmem:[%s3244_s1 + $0x2d8] sm:$0xff] }
 0x11f   : > { %663 = vst [vmem:[%s3253_s10] sm:$0x1] %v662_v29  ;;  %v665_v35 = vmul.f32 %v662_v29, %v2834_v42  ;;  %1684 = vmatpush.bf16.msrb.mxu2 %v2599_v34  ;;  %v2598_v42 = vld [vmem:[%s3244_s1 + $0x1b0] sm:$0xff]  ;;  %1653 = vmatmul.bf16.vlgmr.msra.gmra.mxu3 %v905_v27  ;;  %v2627_v27 = vld [vmem:[%s3244_s1 + $0x298] sm:$0xff]  ;;  %v2609_v33 = vld [vmem:[%s3244_s1 + $0x208] sm:$0xff] }
 0x120   : > { %1697 = vmatpush.bf16.msrb.mxu3 %v2607_v38  ;;  %v2610_v29 = vld [vmem:[%s3244_s1 + $0x210] sm:$0xff]  ;;  %v2617_v34 = vld [vmem:[%s3244_s1 + $0x248] sm:$0xff]  ;;  %v2608_v37 = vld [vmem:[%s3244_s1 + $0x200] sm:$0xff] }
 0x121   : > { %v667_v39 = vsub.f32 %v666_v32, %v665_v35  ;;  %1659 = vmatpush.bf16.msrb.mxu0 %v2582_v40  ;;  %v2634_v32 = vld [vmem:[%s3244_s1 + $0x2d0] sm:$0xff]  ;;  %v2625_v35 = vld [vmem:[%s3244_s1 + $0x288] sm:$0xff]  ;;  %v2616_v38 = vld [vmem:[%s3244_s1 + $0x240] sm:$0xff] }
 0x122   : > { %1672 = vmatpush.bf16.msrb.mxu1 %v2590_v41  ;;  %v2633_v36 = vld [vmem:[%s3244_s1 + $0x2c8] sm:$0xff]  ;;  %v2647_v40 = vld [vmem:[%s3244_s1 + $0x338] sm:$0xff]  ;;  %v2654_v48 = vld [vmem:[%s3244_s1 + $0x370] sm:$0xff] }
 0x123   : > { %668 = vst [vmem:[%s3254_s11] sm:$0x1] %v667_v39  ;;  %1685 = vmatpush.bf16.msrb.mxu2 %v2598_v42  ;;  %v2624_v39 = vld [vmem:[%s3244_s1 + $0x280] sm:$0xff]  ;;  %v2655_v41 = vld [vmem:[%s3244_s1 + $0x378] sm:$0xff] }
 0x124   : > { %1698 = vmatpush.bf16.msrb.mxu3 %v2606_v43  ;;  %v2632_v42 = vld [vmem:[%s3244_s1 + $0x2c0] sm:$0xff] }
 0x125   : > { %1660 = vmatpush.bf16.msrb.mxu0 %v2581_v44  ;;  %v914_v43 = vld.sshfl [vmem:[#allocation1] sm:$0xff pattern:$0x73625140]  ;;  %v915_v44 = vld.sshfl [vmem:[#allocation1 + $0x8] sm:$0xff pattern:$0x73625140] }
 0x126   : > { %1673 = vmatpush.bf16.msrb.mxu1 %v2589_v45  ;;  %v916_v45 = vld.sshfl [vmem:[#allocation1 + $0x10] sm:$0xff pattern:$0x73625140] }
 0x127   : > { %1686 = vmatpush.bf16.msrb.mxu2 %v2597_v46  ;;  %v2646_v46 = vld [vmem:[%s3244_s1 + $0x330] sm:$0xff] }
 0x128   : > { %1699 = vmatpush.bf16.msrb.mxu3 %v2605_v47  ;;  %v917_v47 = vld.sshfl [vmem:[#allocation1 + $0x18] sm:$0xff pattern:$0x73625140] }
 0x129   : > { %1661 = vmatpush.bf16.msrb.mxu0 %v2580_v53  ;;  %v2643_v53 = vld [vmem:[%s3244_s1 + $0x318] sm:$0xff] }
 0x12a   : > { %1674 = vmatpush.bf16.msrb.mxu1 %v2588_v54  ;;  %v2651_v54 = vld [vmem:[%s3244_s1 + $0x358] sm:$0xff] }
 0x12b   : > { %1687 = vmatpush.bf16.msrb.mxu2 %v2596_v55  ;;  %v2642_v55 = vld [vmem:[%s3244_s1 + $0x310] sm:$0xff] }
 0x12c   : > { %1700 = vmatpush.bf16.msrb.mxu3 %v2604_v56  ;;  %v2650_v56 = vld [vmem:[%s3244_s1 + $0x350] sm:$0xff] }
 0x12d   : > { %1662 = vmatpush.bf16.msrb.mxu0 %v2579_v57  ;;  %v2641_v57 = vld [vmem:[%s3244_s1 + $0x308] sm:$0xff] }
 0x12e   : > { %1675 = vmatpush.bf16.msrb.mxu1 %v2587_v58  ;;  %v2649_v58 = vld [vmem:[%s3244_s1 + $0x348] sm:$0xff] }
 0x12f   : > { %1688 = vmatpush.bf16.msrb.mxu2 %v2595_v59  ;;  %v2640_v59 = vld [vmem:[%s3244_s1 + $0x300] sm:$0xff] }
 0x130   : > { %1701 = vmatpush.bf16.msrb.mxu3 %v2603_v60  ;;  %v2648_v60 = vld [vmem:[%s3244_s1 + $0x340] sm:$0xff] }
 0x131   : > { %1663 = vmatpush.bf16.msrb.mxu0 %v2578_v61  ;;  %v918_v61 = vld.sshfl [vmem:[#allocation1 + $0x20] sm:$0xff pattern:$0x73625140] }
 0x132   : > { %1676 = vmatpush.bf16.msrb.mxu1 %v2586_v62  ;;  %v919_v62 = vld.sshfl [vmem:[#allocation1 + $0x28] sm:$0xff pattern:$0x73625140] }
 0x133   : > { %1689 = vmatpush.bf16.msrb.mxu2 %v2594_v63 }
 0x134   : > { %1702 = vmatpush.bf16.msrb.mxu3 %v2602_v0 }
 0x135   : > { %1664 = vmatpush.bf16.msrb.mxu0 %v2577_v1 }
 0x136   : > { %1677 = vmatpush.bf16.msrb.mxu1 %v2585_v2 }
 0x137   : > { %1690 = vmatpush.bf16.msrb.mxu2 %v2593_v3 }
 0x138   : > { %1703 = vmatpush.bf16.msrb.mxu3 %v2601_v4 }
 0x139   : > { %1665 = vmatpush.bf16.msrb.mxu0 %v2576_v5 }
 0x13a   : > { %1678 = vmatpush.bf16.msrb.mxu1 %v2584_v6 }
 0x13b   : > { %1691 = vmatpush.bf16.msrb.mxu2 %v2592_v7 }
 0x13c   : > { %1704 = vmatpush.bf16.msrb.mxu3 %v2600_v11  ;;  %1666 = vmatmul.bf16.vlgmr.msrb.gmra.mxu0 %v906_v50  ;;  %v2653_v50 = vld [vmem:[%s3244_s1 + $0x368] sm:$0xff]  ;;  %v2662_v11 = vld [vmem:[%s3245_s2 + $0x30] sm:$0xff] }
 0x13d   : > { %1710 = vmatpush.bf16.msra.mxu0 %v2615_v8  ;;  %1679 = vmatmul.bf16.vlgmr.msrb.gmra.mxu1 %v907_v52  ;;  %v2652_v52 = vld [vmem:[%s3244_s1 + $0x360] sm:$0xff] }
 0x13e   : > { %1723 = vmatpush.bf16.msra.mxu1 %v2623_v9  ;;  %1692 = vmatmul.bf16.vlgmr.msrb.gmra.mxu2 %v908_v49  ;;  %v2645_v49 = vld [vmem:[%s3244_s1 + $0x328] sm:$0xff] }
 0x13f   : > { %1736 = vmatpush.bf16.msra.mxu2 %v2631_v10  ;;  %1705 = vmatmul.bf16.vlgmr.msrb.gmra.mxu3 %v3001_v51  ;;  %v2644_v51 = vld [vmem:[%s3244_s1 + $0x320] sm:$0xff] }
 0x140   : > { %1749 = vmatpush.bf16.msra.mxu3 %v2639_v12 }
 0x141   : > { %1711 = vmatpush.bf16.msra.mxu0 %v2614_v13 }
 0x142   : > { %1724 = vmatpush.bf16.msra.mxu1 %v2622_v14  ;;  %v2661_v14 = vld [vmem:[%s3245_s2 + $0x28] sm:$0xff] }
 0x143   : > { %1737 = vmatpush.bf16.msra.mxu2 %v2630_v15 }
 0x144   : > { %1750 = vmatpush.bf16.msra.mxu3 %v2638_v16  ;;  %v2660_v16 = vld [vmem:[%s3245_s2 + $0x20] sm:$0xff] }
 0x145   : > { %1712 = vmatpush.bf16.msra.mxu0 %v2613_v17 }
 0x146   : > { %1725 = vmatpush.bf16.msra.mxu1 %v2621_v18 }
 0x147   : > { %1738 = vmatpush.bf16.msra.mxu2 %v2629_v19  ;;  %v2659_v19 = vld [vmem:[%s3245_s2 + $0x18] sm:$0xff] }
 0x148   : > { %1751 = vmatpush.bf16.msra.mxu3 %v2637_v20  ;;  %v2658_v20 = vld [vmem:[%s3245_s2 + $0x10] sm:$0xff] }
 0x149   : > { %1713 = vmatpush.bf16.msra.mxu0 %v2612_v21 }
 0x14a   : > { %1726 = vmatpush.bf16.msra.mxu1 %v2620_v22  ;;  %v2657_v22 = vld [vmem:[%s3245_s2 + $0x8] sm:$0xff] }
 0x14b   : > { %1739 = vmatpush.bf16.msra.mxu2 %v2628_v23 }
 0x14c   : > { %1752 = vmatpush.bf16.msra.mxu3 %v2636_v24 }
 0x14d   : > { %1714 = vmatpush.bf16.msra.mxu0 %v2611_v25 }
 0x14e   : > { %1727 = vmatpush.bf16.msra.mxu1 %v2619_v26  ;;  %v2656_v26 = vld [vmem:[%s3245_s2] sm:$0xff] }
 0x14f   : > { %1740 = vmatpush.bf16.msra.mxu2 %v2627_v27 }
 0x150   : > { %1753 = vmatpush.bf16.msra.mxu3 %v2635_v28 }
 0x151   : > { %1715 = vmatpush.bf16.msra.mxu0 %v2610_v29 }
 0x152   : > { %1728 = vmatpush.bf16.msra.mxu1 %v2618_v30 }
 0x153   : > { %1741 = vmatpush.bf16.msra.mxu2 %v2626_v31 }
 0x154   : > { %1754 = vmatpush.bf16.msra.mxu3 %v2634_v32 }
 0x155   : > { %1716 = vmatpush.bf16.msra.mxu0 %v2609_v33 }
 0x156   : > { %1729 = vmatpush.bf16.msra.mxu1 %v2617_v34 }
 0x157   : > { %1742 = vmatpush.bf16.msra.mxu2 %v2625_v35 }
 0x158   : > { %1755 = vmatpush.bf16.msra.mxu3 %v2633_v36 }
 0x159   : > { %1717 = vmatpush.bf16.msra.mxu0 %v2608_v37 }
 0x15a   : > { %1730 = vmatpush.bf16.msra.mxu1 %v2616_v38 }
 0x15b   : > { %1743 = vmatpush.bf16.msra.mxu2 %v2624_v39 }
 0x15c   : > { %1756 = vmatpush.bf16.msra.mxu3 %v2632_v42  ;;  %1718 = vmatmul.bf16.vlgmr.msra.gmra.mxu0 %v914_v43 }
 0x15d   : > { %1762 = vmatpush.bf16.msrb.mxu0 %v2647_v40  ;;  %1731 = vmatmul.bf16.vlgmr.msra.gmra.mxu1 %v915_v44 }
 0x15e   : > { %1775 = vmatpush.bf16.msrb.mxu1 %v2655_v41  ;;  %1744 = vmatmul.bf16.vlgmr.msra.gmra.mxu2 %v916_v45 }
 0x15f   : > { %1757 = vmatmul.bf16.vlgmr.msra.gmra.mxu3 %v917_v47  ;;  %1851 = vmatpush.bf16.msrb.mxu2 %v2662_v11 }
 0x161   : > { %1763 = vmatpush.bf16.msrb.mxu0 %v2646_v46 }
 0x162   : > { %1776 = vmatpush.bf16.msrb.mxu1 %v2654_v48 }
 0x163   : > { %1852 = vmatpush.bf16.msrb.mxu2 %v2661_v14 }
 0x165   : > { %1764 = vmatpush.bf16.msrb.mxu0 %v2645_v49  ;;  %v2716_v49 = vmov 4.0  }
 0x166   : > { %1777 = vmatpush.bf16.msrb.mxu1 %v2653_v50  ;;  %2699 = vrcp.f32 %v2716_v49 }
 0x167   : > { %1853 = vmatpush.bf16.msrb.mxu2 %v2660_v16 }
 0x169   : > { %1765 = vmatpush.bf16.msrb.mxu0 %v2644_v51 }
 0x16a   : > { %1778 = vmatpush.bf16.msrb.mxu1 %v2652_v52 }
 0x16b   : > { %1854 = vmatpush.bf16.msrb.mxu2 %v2659_v19 }
 0x16c   : > { %v2700_v50 = vpop.eup %2699 }
 0x16d   : > { %1766 = vmatpush.bf16.msrb.mxu0 %v2643_v53  ;;  %v1872_v51 = vmul.f32 4.0, %v2700_v50  ;;  %vm1876_vm5 = vweird.f32 %v2700_v50 }
 0x16e   : > { %1779 = vmatpush.bf16.msrb.mxu1 %v2651_v54 }
 0x16f   : > { %1855 = vmatpush.bf16.msrb.mxu2 %v2658_v20  ;;  %v1873_v52 = vsub.f32 1.0, %v1872_v51 }
 0x171   : > { %1767 = vmatpush.bf16.msrb.mxu0 %v2642_v55 }
 0x172   : > { %1780 = vmatpush.bf16.msrb.mxu1 %v2650_v56  ;;  %v1874_v56 = vmul.f32 %v2700_v50, %v1873_v52 }
 0x173   : > { %1856 = vmatpush.bf16.msrb.mxu2 %v2657_v22  ;;  %v1906_v22 = vld [vmem:[%s3247_s4] sm:$0x1] }
 0x175   : > { %1768 = vmatpush.bf16.msrb.mxu0 %v2641_v57 }
 0x176   : > { %1781 = vmatpush.bf16.msrb.mxu1 %v2649_v58 }
 0x177   : > { %1857 = vmatpush.bf16.msrb.mxu2 %v2656_v26 }
 0x179   : > { %1769 = vmatpush.bf16.msrb.mxu0 %v2640_v59  ;;  %v1875_v59 = vadd.f32 %v2700_v50, %v1874_v56 }
 0x17a   : > { %1782 = vmatpush.bf16.msrb.mxu1 %v2648_v60 }
 0x17c   : > { %1770 = vmatmul.bf16.vlgmr.msrb.gmra.mxu0 %v918_v61 }
 0x17d   : > { %1783 = vmatmul.bf16.vlgmr.msrb.gmra.mxu1 %v919_v62 }
 0x199   : > { %v1615_v63 = vpop.f32.mrf.mxu0 }
 0x19a   : > { %v1628_v0 = vpop.f32.mrf.mxu1 }
 0x19b   : > { %v1629_v1 = vadd.f32 %v1628_v0, %v1615_v63  ;;  %v1877_v63 = vsel %vm1876_vm5, %v2700_v50, %v1875_v59 }
 0x1a1   : > { %v1641_v2 = vpop.f32.mrf.mxu2  ;;  %v1617_v3 = vpop.f32.mrf.mxu0 }
 0x1a2   : > { %v1654_v4 = vpop.f32.mrf.mxu3  ;;  %v1630_v5 = vpop.f32.mrf.mxu1  ;;  %v1642_v21 = vadd.f32 %v1641_v2, %v1629_v1 }
 0x1a4   : > { %v1655_v23 = vadd.f32 %v1654_v4, %v1642_v21 }
 0x1a9   : > { %v1643_v6 = vpop.f32.mrf.mxu2 }
 0x1aa   : > { %v1656_v7 = vpop.f32.mrf.mxu3 }
 0x1b9   : > { %v1667_v8 = vpop.f32.mrf.mxu0 }
 0x1ba   : > { %v1680_v9 = vpop.f32.mrf.mxu1  ;;  %v1668_v27 = vadd.f32 %v1667_v8, %v1655_v23 }
 0x1bc   : > { %v1681_v29 = vadd.f32 %v1680_v9, %v1668_v27 }
 0x1c1   : > { %v1693_v10 = vpop.f32.mrf.mxu2  ;;  %v1669_v13 = vpop.f32.mrf.mxu0 }
 0x1c2   : > { %v1706_v12 = vpop.f32.mrf.mxu3  ;;  %v1682_v15 = vpop.f32.mrf.mxu1  ;;  %v1694_v33 = vadd.f32 %v1693_v10, %v1681_v29 }
 0x1c4   : > { %v1707_v35 = vadd.f32 %v1706_v12, %v1694_v33 }
 0x1c9   : > { %v1695_v17 = vpop.f32.mrf.mxu2 }
 0x1ca   : > { %v1708_v18 = vpop.f32.mrf.mxu3 }
 0x1cb   : > { %v1889_v18 = vld [vmem:[%s3246_s3] sm:$0x1] }
 0x1d9   : > { %v1719_v24 = vpop.f32.mrf.mxu0 }
 0x1da   : > { %v1732_v25 = vpop.f32.mrf.mxu1  ;;  %v1720_v37 = vadd.f32 %v1719_v24, %v1707_v35 }
 0x1dc   : > { %v1733_v38 = vadd.f32 %v1732_v25, %v1720_v37 }
 0x1e1   : > { %v1745_v28 = vpop.f32.mrf.mxu2  ;;  %v1721_v31 = vpop.f32.mrf.mxu0 }
 0x1e2   : > { %v1758_v30 = vpop.f32.mrf.mxu3  ;;  %v1734_v32 = vpop.f32.mrf.mxu1  ;;  %v1746_v39 = vadd.f32 %v1745_v28, %v1733_v38 }
 0x1e4   : > { %v1759_v40 = vadd.f32 %v1758_v30, %v1746_v39 }
 0x1e9   : > { %v1747_v34 = vpop.f32.mrf.mxu2 }
 0x1ea   : > { %v1760_v36 = vpop.f32.mrf.mxu3 }
 0x1f9   : > { %v1771_v41 = vpop.f32.mrf.mxu0 }
 0x1fa   : > { %v1772_v42 = vadd.f32 %v1771_v41, %v1759_v40  ;;  %v1784_v43 = vpop.f32.mrf.mxu1 }
 0x1fc   : > { %v1785_v44 = vadd.f32 %v1784_v43, %v1772_v42 }
 0x1fe   : > { %v1788_v45 = vmax.f32 %v1785_v44, 0.0 }
 0x200   : > { %v1789_v46 = vpack.c.bf16 %v1788_v45, %v1788_v45 }
 0x201   : > { %v1773_v47 = vpop.f32.mrf.mxu0 }
 0x202   : > { %v1786_v48 = vpop.f32.mrf.mxu1  ;;  %2524 = vmatmul.msk.bf16.vlgmr.msrb.gmra.mxu2 %vm1846_vm3, %v1789_v46 }
 0x285   : > { %v1859_v53 = vpop.f32.mrf.mxu2 }
 0x286   : > { %v1864_v54 = vsel %vm1863_vm4, %v1859_v53, 0.0 }
 0x287   : > { %v1865_v55 = vrot.slane %v1864_v54, 4 }
 0x289   : > { %v1866_v57 = vadd.f32 %v1865_v55, %v1864_v54 }
 0x28b   : > { %v1867_v58 = vrot.slane %v1866_v57, 2 }
 0x28d   : > { %v1868_v60 = vadd.f32 %v1867_v58, %v1866_v57  ;;  %v1861_v61 = vpop.f32.mrf.mxu2 }
 0x28f   : > { %v1869_v62 = vrot.slane %v1868_v60, 1 }
 0x291   : > { %v1870_v0 = vadd.f32 %v1869_v62, %v1868_v60 }
 0x293   : > { %v1878_v1 = vmul.f32 %v1877_v63, %v1870_v0 }
 0x295   : > { %v1879_v2 = vsub.f32 %v1859_v53, %v1878_v1 }
 0x297   : > { %v1880_v3 = vmul.f32 %v1879_v2, %v1879_v2 }
 0x299   : > { %v1881_v4 = vsel %vm1863_vm4, %v1880_v3, 0.0 }
 0x29a   : > { %v1882_v5 = vrot.slane %v1881_v4, 4 }
 0x29c   : > { %v1883_v6 = vadd.f32 %v1882_v5, %v1881_v4 }
 0x29e   : > { %v1884_v7 = vrot.slane %v1883_v6, 2 }
 0x2a0   : > { %v1885_v8 = vadd.f32 %v1884_v7, %v1883_v6 }
 0x2a2   : > { %v1886_v9 = vrot.slane %v1885_v8, 1 }
 0x2a4   : > { %v1887_v10 = vadd.f32 %v1886_v9, %v1885_v8 }
 0x2a6   : > { %v1888_v11 = vmul.f32 %v1887_v10, %v1877_v63 }
 0x2a8   : > { %v1890_v12 = vadd.f32 1e-05, %v1888_v11 }
 0x2aa   : > { %2701 = vrsqrt.f32 %v1890_v12  ;;  %vm1897_vm7 = vweird.f32 %v1890_v12 }
 0x2b0   : > { %v2702_v13 = vpop.eup %2701 }
 0x2b1   : > { %v1892_v14 = vmul.f32 %v2702_v13, %v1890_v12  ;;  %vm1898_vm6 = vweird.f32 %v2702_v13 }
 0x2b2   : > { %vm1899_vm8 = vmor %vm1897_vm7, %vm1898_vm6 }
 0x2b3   : > { %v1893_v15 = vmul.f32 %v2702_v13, %v1892_v14 }
 0x2b5   : > { %v1894_v16 = vmul.f32 0.5, %v1893_v15 }
 0x2b7   : > { %v1895_v17 = vsub.f32 1.5, %v1894_v16 }
 0x2b9   : > { %v1896_v19 = vmul.f32 %v2702_v13, %v1895_v17 }
 0x2bb   : > { %v1900_v20 = vsel %vm1899_vm8, %v2702_v13, %v1896_v19 }
 0x2bc   : > { %v1901_v21 = vmul.f32 %v1900_v20, %v1889_v18 }
 0x2be   : > { %v1903_v23 = vperm.slane %v1901_v21, 0  ;;  %v1907_v24 = vmul.f32 %v1901_v21, %v1878_v1 }
 0x2c0   : > { %v1908_v25 = vsub.f32 %v1906_v22, %v1907_v24  ;;  %v1905_v26 = vmul.f32 %v1903_v23, %v1859_v53 }
 0x2c2   : > { %v1910_v27 = vperm.slane %v1908_v25, 0 }
 0x2c4   : > { %v1912_v28 = vadd.f32 %v1910_v27, %v1905_v26 }
 0x2c6   : > { %v1913_v29 = vsub.f32 0.0, %v1912_v28 }
 0x2c8   : > { %v1914_v30 = vmul.f32 1.442695, %v1913_v29 }
 0x2ca   : > { %2703 = vpow2.f32 %v1914_v30 }
 0x2d0   : > { %v2704_v31 = vpop.eup %2703 }
 0x2d1   : > { %v1916_v32 = vadd.f32 1.0, %v2704_v31 }
 0x2d3   : > { %2705 = vrcp.f32 %v1916_v32  ;;  %v1928_v36 = vand.u32 2147483648, %v1916_v32  ;;  %v1926_v38 = vand.u32 2147483647, %v1916_v32  ;;  %vm1922_vm10 = vweird.f32 %v1916_v32 }
 0x2d5   : > { %v1929_v40 = vor.u32 1.1754944e-38, %v1928_v36  ;;  %vm1927_vm12 = vcmp.eq.f32.partialorder %v1926_v38, 8.507059e+37 }
 0x2d9   : > { %v2706_v33 = vpop.eup %2705 }
 0x2da   : > { %v1918_v34 = vmul.f32 %v2706_v33, %v1916_v32  ;;  %vm1923_vm9 = vweird.f32 %v2706_v33 }
 0x2db   : > { %vm1924_vm11 = vmor %vm1922_vm10, %vm1923_vm9 }
 0x2dc   : > { %v1919_v35 = vsub.f32 1.0, %v1918_v34 }
 0x2de   : > { %v1920_v37 = vmul.f32 %v2706_v33, %v1919_v35 }
 0x2e0   : > { %v1921_v39 = vadd.f32 %v2706_v33, %v1920_v37 }
 0x2e2   : > { %v1925_v41 = vsel %vm1924_vm11, %v2706_v33, %v1921_v39 }
 0x2e3   : > { %v1930_v42 = vsel %vm1927_vm12, %v1929_v40, %v1925_v41 }
 0x2e4   : > { %1932 = vst [vmem:[%s3252_s9] sm:$0xf] %v1930_v42 }
 0x2e5 PF: > { %s24_s21 = sadd.s32 1, %s2713_s21  }
 0x2e6   : > { %p21_p6 = scmp.ge.s32.totalorder %s24_s21, 6  }
 0x2e8   :  { %23 = sbr.rel (!%p21_p6) target bundleno = 3 (0x3), region = 107 }

// kernel: _lambda_.3
= control target key start
LH: loop header
LB: loop body
LE: loop exit
PB: predicated region body
PF: predicated region fallthrough
CT: control target
= control target key end

     0   :  { %s1400_s24 = smov 0   ;;  %s2028_s0 = inlined_call_operand.vmem [shape: f32[4,1,128], index: 0, kind: input, shape index: {}]   ;;  %s2029_s1 = inlined_call_operand.vmem [shape: f32[1,128], index: 1, kind: input, shape index: {}]   ;;  %s2030_s2 = inlined_call_operand.vmem [shape: f32[1,128], index: 2, kind: input, shape index: {}]   ;;  %s2031_s3 = inlined_call_operand.vmem [shape: bf16[576,128], index: 3, kind: input, shape index: {}]   ;;  %s2032_s4 = inlined_call_operand.vmem [shape: bf16[128,128], index: 4, kind: input, shape index: {}]   ;;  %s2033_s5 = inlined_call_operand.vmem [shape: f32[576,128], index: 5, kind: input, shape index: {}, may-alias: {5,6}]   ;;  %s2034_s6 = inlined_call_operand.vmem [shape: f32[576,128], index: 6, kind: output, shape index: {0}, may-alias: {5,6}]   ;;  %s2035_s7 = inlined_call_operand.vmem [shape: f32[576,128], index: 7, kind: output, shape index: {1}]  }
   0x1 LB: > { %s1406_s25 = sadd.s32 4294967295, %s1358_s24   ;;  %p1153_p0 = scmp.ge.s32.totalorder %s1358_s24, 1  ;;  %s1358_s24 = sphi %s1400_s24, %s18_s24  }
   0x2   : > { %p260_p1 = scmp.lt.s32.totalorder %s1358_s24, 5 }
   0x4   : > { %p261_p2 = pnand %p1153_p0, %p260_p1 }
   0x5   : > { %p305_p3 = scmp.lt.s32.totalorder (!%p261_p2), %s1406_s25, 3  ;;  %s308_s15 = smul.u32 (!%p261_p2), 18, %s1406_s25 }
   0x6   : > { %264 = sbr.rel (%p261_p2) target bundleno = 304 (0x130), region = 44 }
   0x7   : > { %p309_p4 = scmp.lt.s32.totalorder (!%p261_p2), %s308_s15, 71 }
   0xb   : > { %v1244_v0 = vld [vmem:[%s2032_s4 + $0x38] sm:$0xff]  ;;  %v1243_v1 = vld [vmem:[%s2032_s4 + $0x30] sm:$0xff]  ;;  %s1418_s30 = scalar_select %p305_p3, %s1406_s25, 3  ;;  %v1242_v2 = vld [vmem:[%s2032_s4 + $0x28] sm:$0xff] }
   0xc   : > { %1246 = vmatpush.bf16.msra.mxu2 %v1244_v0  ;;  %1247 = vmatpush.bf16.msra.mxu3 %v1244_v0  ;;  %v1241_v3 = vld [vmem:[%s2032_s4 + $0x20] sm:$0xff]  ;;  %v1240_v4 = vld [vmem:[%s2032_s4 + $0x18] sm:$0xff]  ;;  %v1239_v5 = vld [vmem:[%s2032_s4 + $0x10] sm:$0xff]  ;;  %s2083_s15 = smov (!%p309_p4, %s308_s15), 71 }
   0xd   : > { %468 = vmatpush.bf16.msra.mxu0 %v1244_v0  ;;  %1245 = vmatpush.bf16.msra.mxu1 %v1244_v0  ;;  %s307_s10 = scalar_lea.vmem %s2028_s0, %s1418_s30  ;;  %v1238_v6 = vld [vmem:[%s2032_s4 + $0x8] sm:$0xff]  ;;  %s1154_s22 = sshll.u32 %s2083_s15, 2  ;;  %v1237_v7 = vld [vmem:[%s2032_s4] sm:$0xff] }
   0xe   : > { %s312_s28 = scalar_lea.vmem %s2031_s3, %s1154_s22  ;;  %v1452_v17 = vld [vmem:[%s2029_s1] ss:$0 sm:$0xff]  ;;  %s1543_s12 = sshll.u32 %s2083_s15, 3 }
   0xf   : > { %v1232_v8 = vld [vmem:[%s312_s28 + $0x20] sm:$0xff]  ;;  %v1235_v9 = vld [vmem:[%s312_s28 + $0x38] sm:$0xff]  ;;  %v1230_v11 = vld [vmem:[%s312_s28 + $0x10] sm:$0xff]  ;;  %s1564_s17 = scalar_lea.vmem %s2033_s5, %s1543_s12  ;;  %s1604_s18 = scalar_lea.vmem %s2035_s7, %s1543_s12 }
  0x10   : > { %1249 = vmatpush.bf16.msra.mxu2 %v1243_v1  ;;  %1250 = vmatpush.bf16.msra.mxu3 %v1243_v1  ;;  %v1228_v10 = vld [vmem:[%s312_s28] sm:$0xff]  ;;  %v1233_v12 = vld [vmem:[%s312_s28 + $0x28] sm:$0xff]  ;;  %v1231_v15 = vld [vmem:[%s312_s28 + $0x18] sm:$0xff]  ;;  %s1789_s21 = scalar_lea.vmem %s2034_s6, %s1543_s12 }
  0x11   : > { %469 = vmatpush.bf16.msra.mxu0 %v1243_v1  ;;  %1248 = vmatpush.bf16.msra.mxu1 %v1243_v1  ;;  %v1236_v13 = vld [vmem:[%s312_s28 + $0x40] sm:$0xff]  ;;  %v1229_v14 = vld [vmem:[%s312_s28 + $0x8] sm:$0xff]  ;;  %v1234_v16 = vld [vmem:[%s312_s28 + $0x30] sm:$0xff] }
  0x12   : > { %v1458_v21 = vld [vmem:[%s2030_s2] ss:$0 sm:$0xff] }
  0x14   : > { %1252 = vmatpush.bf16.msra.mxu2 %v1242_v2  ;;  %1253 = vmatpush.bf16.msra.mxu3 %v1242_v2 }
  0x15   : > { %470 = vmatpush.bf16.msra.mxu0 %v1242_v2  ;;  %1251 = vmatpush.bf16.msra.mxu1 %v1242_v2 }
  0x18   : > { %1255 = vmatpush.bf16.msra.mxu2 %v1241_v3  ;;  %1256 = vmatpush.bf16.msra.mxu3 %v1241_v3 }
  0x19   : > { %471 = vmatpush.bf16.msra.mxu0 %v1241_v3  ;;  %1254 = vmatpush.bf16.msra.mxu1 %v1241_v3 }
  0x1c   : > { %1258 = vmatpush.bf16.msra.mxu2 %v1240_v4  ;;  %1259 = vmatpush.bf16.msra.mxu3 %v1240_v4 }
  0x1d   : > { %472 = vmatpush.bf16.msra.mxu0 %v1240_v4  ;;  %1257 = vmatpush.bf16.msra.mxu1 %v1240_v4 }
  0x20   : > { %1261 = vmatpush.bf16.msra.mxu2 %v1239_v5  ;;  %1262 = vmatpush.bf16.msra.mxu3 %v1239_v5 }
  0x21   : > { %473 = vmatpush.bf16.msra.mxu0 %v1239_v5  ;;  %1260 = vmatpush.bf16.msra.mxu1 %v1239_v5 }
  0x24   : > { %1264 = vmatpush.bf16.msra.mxu2 %v1238_v6  ;;  %1265 = vmatpush.bf16.msra.mxu3 %v1238_v6 }
  0x25   : > { %474 = vmatpush.bf16.msra.mxu0 %v1238_v6  ;;  %1263 = vmatpush.bf16.msra.mxu1 %v1238_v6 }
  0x28   : > { %1267 = vmatpush.bf16.msra.mxu2 %v1237_v7  ;;  %1268 = vmatpush.bf16.msra.mxu3 %v1237_v7 }
  0x29   : > { %475 = vmatpush.bf16.msra.mxu0 %v1237_v7  ;;  %1266 = vmatpush.bf16.msra.mxu1 %v1237_v7 }
  0x2b   : > { %496 = vmatmul.bf16.vlgmr.msra.gmra.mxu2 %v1232_v8  ;;  %511 = vmatmul.bf16.vlgmr.msra.gmra.mxu3 %v1235_v9  ;;  %v1584_v9 = vld [vmem:[%s1564_s17 + $0x20] sm:$0xff] }
  0x2c   : > { %476 = vmatmul.bf16.vlgmr.msra.gmra.mxu0 %v1228_v10  ;;  %486 = vmatmul.bf16.vlgmr.msra.gmra.mxu1 %v1230_v11 }
  0x3b   : > { %501 = vmatmul.bf16.gmra.mxu2 %v1233_v12  ;;  %516 = vmatmul.bf16.gmra.mxu3 %v1236_v13 }
  0x3c   : > { %481 = vmatmul.bf16.gmra.mxu0 %v1229_v14  ;;  %491 = vmatmul.bf16.gmra.mxu1 %v1231_v15 }
  0x4b   : > { %506 = vmatmul.bf16.gmra.mxu2 %v1234_v16 }
  0xa9   : > { %v477_v18 = vpop.f32.mrf.mxu0  ;;  %v487_v19 = vpop.f32.mrf.mxu1 }
  0xaa   : > { %v526_v20 = vmul.f32 %v1452_v17, %v477_v18  ;;  %v530_v22 = vmul.f32 %v1452_v17, %v487_v19 }
  0xac   : > { %v548_v23 = vadd.f32 %v1458_v21, %v526_v20  ;;  %v552_v24 = vadd.f32 %v1458_v21, %v530_v22 }
  0xae   : > { %v566_v25 = vsub.f32 0.0, %v548_v23  ;;  %v570_v26 = vsub.f32 0.0, %v552_v24  ;;  %v497_v27 = vpop.f32.mrf.mxu2  ;;  %v512_v28 = vpop.f32.mrf.mxu3 }
  0xaf   : > { %v534_v29 = vmul.f32 %v1452_v17, %v497_v27  ;;  %v540_v30 = vmul.f32 %v1452_v17, %v512_v28 }
  0xb0   : > { %v584_v31 = vmul.f32 1.442695, %v566_v25  ;;  %v592_v32 = vmul.f32 1.442695, %v570_v26 }
  0xb1   : > { %v556_v33 = vadd.f32 %v1458_v21, %v534_v29  ;;  %v562_v34 = vadd.f32 %v1458_v21, %v540_v30  ;;  %v479_v35 = vpop.f32.mrf.mxu0  ;;  %v489_v36 = vpop.f32.mrf.mxu1 }
  0xb2   : > { %1280 = vpow2.f32 %v584_v31  ;;  %v527_v37 = vmul.f32 %v1452_v17, %v479_v35  ;;  %v531_v38 = vmul.f32 %v1452_v17, %v489_v36 }
  0xb3   : > { %1282 = vpow2.f32 %v592_v32  ;;  %v574_v39 = vsub.f32 0.0, %v556_v33  ;;  %v580_v40 = vsub.f32 0.0, %v562_v34 }
  0xb4   : > { %v549_v41 = vadd.f32 %v1458_v21, %v527_v37  ;;  %v553_v42 = vadd.f32 %v1458_v21, %v531_v38 }
  0xb5   : > { %v600_v43 = vmul.f32 1.442695, %v574_v39  ;;  %v612_v44 = vmul.f32 1.442695, %v580_v40 }
  0xb6   : > { %v567_v45 = vsub.f32 0.0, %v549_v41  ;;  %v571_v46 = vsub.f32 0.0, %v553_v42  ;;  %v499_v47 = vpop.f32.mrf.mxu2  ;;  %v514_v48 = vpop.f32.mrf.mxu3 }
  0xb7   : > { %1284 = vpow2.f32 %v600_v43  ;;  %v535_v49 = vmul.f32 %v1452_v17, %v499_v47  ;;  %v541_v52 = vmul.f32 %v1452_v17, %v514_v48 }
  0xb8   : > { %v1281_v50 = vpop.eup %1280  ;;  %1286 = vpow2.f32 %v612_v44  ;;  %v586_v51 = vmul.f32 1.442695, %v567_v45  ;;  %v594_v55 = vmul.f32 1.442695, %v571_v46 }
  0xb9   : > { %v1283_v53 = vpop.eup %1282  ;;  %v620_v54 = vadd.f32 1.0, %v1281_v50  ;;  %v557_v56 = vadd.f32 %v1458_v21, %v535_v49  ;;  %v563_v60 = vadd.f32 %v1458_v21, %v541_v52  ;;  %v482_v1 = vpop.f32.mrf.mxu0  ;;  %v1554_v52 = vld [vmem:[%s307_s10] ss:$0 sm:$0xff] }
  0xba   : > { %v1474_v57 = vadd.f32 1.0, %v1283_v53  ;;  %1288 = vpow2.f32 %v586_v51  ;;  %v528_v4 = vmul.f32 %v1452_v17, %v482_v1  ;;  %v492_v5 = vpop.f32.mrf.mxu1 }
  0xbb   : > { %1290 = vrcp.f32 %v620_v54  ;;  %v647_v58 = vand.u32 2147483647, %v620_v54  ;;  %v649_v59 = vand.u32 2147483648, %v620_v54  ;;  %v575_v0 = vsub.f32 0.0, %v557_v56 }
  0xbc   : > { %1292 = vrcp.f32 %v1474_v57  ;;  %v707_v62 = vand.u32 2147483647, %v1474_v57  ;;  %v709_v63 = vand.u32 2147483648, %v1474_v57  ;;  %vm643_vm0 = vweird.f32 %v620_v54 }
  0xbd   : > { %v1285_v61 = vpop.eup %1284  ;;  %1294 = vpow2.f32 %v594_v55  ;;  %vm703_vm1 = vweird.f32 %v1474_v57  ;;  %v532_v7 = vmul.f32 %v1452_v17, %v492_v5  ;;  %vm1487_vm2 = vcmp.eq.f32.partialorder %v647_v58, 8.507059e+37 }
  0xbe   : > { %v1287_v2 = vpop.eup %1286  ;;  %v1480_v3 = vadd.f32 1.0, %v1285_v61  ;;  %v650_v10 = vor.u32 1.1754944e-38, %v649_v59  ;;  %vm1493_vm3 = vcmp.eq.f32.partialorder %v707_v62, 8.507059e+37  ;;  %v710_v14 = vor.u32 1.1754944e-38, %v709_v63 }
  0xbf   : > { %v1484_v6 = vadd.f32 1.0, %v1287_v2  ;;  %v602_v15 = vmul.f32 1.442695, %v575_v0  ;;  %v581_v16 = vsub.f32 0.0, %v563_v60  ;;  %v1501_v23 = vadd.f32 %v1458_v21, %v528_v4  ;;  %v1571_v0 = vld [vmem:[%s1564_s17] sm:$0xff]  ;;  %v517_v4 = vpop.f32.mrf.mxu3 }
  0xc0   : > { %v1289_v8 = vpop.eup %1288  ;;  %1296 = vrcp.f32 %v1480_v3  ;;  %v769_v11 = vand.u32 2147483648, %v1480_v3  ;;  %v767_v26 = vand.u32 2147483647, %v1480_v3  ;;  %v1507_v27 = vadd.f32 %v1458_v21, %v532_v7 }
  0xc1   : > { %v1291_v12 = vpop.eup %1290  ;;  %1298 = vrcp.f32 %v1484_v6  ;;  %v857_v20 = vand.u32 2147483647, %v1484_v6  ;;  %v859_v22 = vand.u32 2147483648, %v1484_v6  ;;  %vm853_vm4 = vweird.f32 %v1484_v6 }
  0xc2   : > { %v1293_v18 = vpop.eup %1292  ;;  %v639_v19 = vmul.f32 %v1291_v12, %v620_v54  ;;  %vm644_vm5 = vweird.f32 %v1291_v12  ;;  %v1509_v29 = vor.u32 1.1754944e-38, %v769_v11  ;;  %v1511_v30 = vadd.f32 1.0, %v1289_v8 }
  0xc3   : > { %v1295_v24 = vpop.eup %1294  ;;  %v699_v25 = vmul.f32 %v1293_v18, %v1474_v57  ;;  %vm704_vm6 = vweird.f32 %v1293_v18  ;;  %vm763_vm7 = vweird.f32 %v1480_v3  ;;  %1300 = vpow2.f32 %v602_v15  ;;  %vm1522_vm9 = vmor %vm643_vm0, %vm644_vm5 }
  0xc4   : > { %v640_v28 = vsub.f32 1.0, %v639_v19  ;;  %v1514_v32 = vadd.f32 1.0, %v1295_v24  ;;  %vm1516_vm8 = vcmp.eq.f32.partialorder %v857_v20, 8.507059e+37  ;;  %v860_v36 = vor.u32 1.1754944e-38, %v859_v22  ;;  %vm1535_vm11 = vmor %vm703_vm1, %vm704_vm6 }
  0xc5   : > { %v700_v31 = vsub.f32 1.0, %v699_v25  ;;  %1302 = vrcp.f32 %v1511_v30  ;;  %vm1527_vm10 = vcmp.eq.f32.partialorder %v767_v26, 8.507059e+37  ;;  %v664_v42 = vand.u32 2147483648, %v1511_v30  ;;  %v1615_v25 = vld [vmem:[%s1564_s17 + $0x40] sm:$0xff] }
  0xc6   : > { %v1297_v33 = vpop.eup %1296  ;;  %v641_v34 = vmul.f32 %v1291_v12, %v640_v28  ;;  %v614_v43 = vmul.f32 1.442695, %v581_v16  ;;  %vm658_vm12 = vweird.f32 %v1511_v30  ;;  %v568_v47 = vsub.f32 0.0, %v1501_v23 }
  0xc7   : > { %v1299_v37 = vpop.eup %1298  ;;  %v701_v39 = vmul.f32 %v1293_v18, %v700_v31  ;;  %v759_v40 = vmul.f32 %v1297_v33, %v1480_v3  ;;  %v662_v50 = vand.u32 2147483647, %v1511_v30  ;;  %1304 = vrcp.f32 %v1514_v32 }
  0xc8   : > { %v642_v44 = vadd.f32 %v1291_v12, %v641_v34  ;;  %v849_v46 = vmul.f32 %v1299_v37, %v1484_v6  ;;  %vm764_vm13 = vweird.f32 %v1297_v33  ;;  %vm854_vm14 = vweird.f32 %v1299_v37 }
  0xc9   : > { %v702_v48 = vadd.f32 %v1293_v18, %v701_v39  ;;  %v760_v49 = vsub.f32 1.0, %v759_v40  ;;  %v1301_v54 = vpop.eup %1300  ;;  %v665_v58 = vor.u32 1.1754944e-38, %v664_v42  ;;  %v722_v63 = vand.u32 2147483647, %v1514_v32  ;;  %vm1577_vm15 = vmor %vm853_vm4, %vm854_vm14 }
  0xca   : > { %v646_v51 = vsel %vm1522_vm9, %v1291_v12, %v642_v44  ;;  %v850_v53 = vsub.f32 1.0, %v849_v46  ;;  %v724_v7 = vand.u32 2147483648, %v1514_v32  ;;  %vm765_vm0 = vmor %vm763_vm7, %vm764_vm13  ;;  %v1589_v11 = vadd.f32 1.0, %v1301_v54 }
  0xcb   : > { %v651_v55 = vsel %vm1487_vm2, %v650_v10, %v646_v51  ;;  %v706_v56 = vsel %vm1535_vm11, %v1293_v18, %v702_v48  ;;  %v761_v57 = vmul.f32 %v1297_v33, %v760_v49  ;;  %v1303_v59 = vpop.eup %1302  ;;  %1306 = vpow2.f32 %v614_v43  ;;  %v502_v48 = vpop.f32.mrf.mxu2 }
  0xcc   : > { %v912_v60 = vadd.f32 %v1554_v52, %v651_v55  ;;  %v711_v61 = vsel %vm1493_vm3, %v710_v14, %v706_v56  ;;  %v851_v62 = vmul.f32 %v1299_v37, %v850_v53  ;;  %v654_v5 = vmul.f32 %v1303_v59, %v1511_v30 }
  0xcd   : > { %v916_v1 = vadd.f32 %v1554_v52, %v711_v61  ;;  %v762_v2 = vadd.f32 %v1297_v33, %v761_v57  ;;  %vm659_vm1 = vweird.f32 %v1303_v59  ;;  %v1305_v6 = vpop.eup %1304  ;;  %vm718_vm3 = vweird.f32 %v1514_v32  ;;  %v484_v61 = vpop.f32.mrf.mxu0 }
  0xce   : > { %v930_v8 = vmul.f32 0.5, %v912_v60  ;;  %v852_v10 = vadd.f32 %v1299_v37, %v851_v62  ;;  %v655_v14 = vsub.f32 1.0, %v654_v5  ;;  %v714_v18 = vmul.f32 %v1305_v6, %v1514_v32  ;;  %vm1621_vm2 = vmor %vm658_vm12, %vm659_vm1 }
  0xcf   : > { %v934_v12 = vmul.f32 0.5, %v916_v1  ;;  %v766_v13 = vsel %vm765_vm0, %v1297_v33, %v762_v2  ;;  %vm719_vm4 = vweird.f32 %v1305_v6  ;;  %v1629_v33 = vld [vmem:[%s1564_s17 + $0x70] sm:$0xff]  ;;  %vm663_vm5 = vcmp.eq.f32.partialorder %v662_v50, 8.507059e+37  ;;  %v1687_v1 = vld [vmem:[%s1564_s17 + $0x28] sm:$0xff] }
  0xd0   : > { %v1592_v15 = vmul.f32 %v1571_v0, %v930_v8  ;;  %v771_v16 = vsel %vm1527_vm10, %v1509_v29, %v766_v13  ;;  %v856_v3 = vsel %vm1577_vm15, %v1299_v37, %v852_v10  ;;  %v656_v24 = vmul.f32 %v1303_v59, %v655_v14  ;;  %vm1644_vm7 = vmor %vm718_vm3, %vm719_vm4 }
  0xd1   : > { %v1607_v19 = vmul.f32 %v1584_v9, %v934_v12  ;;  %v920_v20 = vadd.f32 %v1554_v52, %v771_v16  ;;  %v861_v22 = vsel %vm1516_vm8, %v860_v36, %v856_v3  ;;  %v715_v29 = vsub.f32 1.0, %v714_v18  ;;  %v1307_v38 = vpop.eup %1306 }
  0xd2   : > { %984 = vst [vmem:[%s1604_s18] sm:$0xff] %v1592_v15  ;;  %v926_v26 = vadd.f32 %v1554_v52, %v861_v22  ;;  %v657_v34 = vadd.f32 %v1303_v59, %v656_v24  ;;  %1308 = vrcp.f32 %v1589_v11  ;;  %vm1632_vm6 = vcmp.eq.f32.partialorder %v722_v63, 8.507059e+37  ;;  %v494_v22 = vpop.f32.mrf.mxu1 }
  0xd3   : > { %988 = vst [vmem:[%s1604_s18 + $0x20] sm:$0xff] %v1607_v19  ;;  %v938_v31 = vmul.f32 0.5, %v920_v20  ;;  %v716_v30 = vmul.f32 %v1305_v6, %v715_v29  ;;  %v572_v37 = vsub.f32 0.0, %v1507_v27  ;;  %v725_v42 = vor.u32 1.1754944e-38, %v724_v7  ;;  %v504_v36 = vpop.f32.mrf.mxu2 }
  0xd4   : > { %v944_v35 = vmul.f32 0.5, %v926_v26  ;;  %v661_v40 = vsel %vm1621_vm2, %v1303_v59, %v657_v34  ;;  %v588_v43 = vmul.f32 1.442695, %v568_v47  ;;  %v782_v46 = vand.u32 2147483647, %v1589_v11  ;;  %v1666_v47 = vld [vmem:[%s1564_s17 + $0x8] sm:$0xff] }
  0xd5   : > { %v1638_v39 = vmul.f32 %v1615_v25, %v938_v31  ;;  %v666_v44 = vsel %vm663_vm5, %v665_v58, %v661_v40  ;;  %v717_v45 = vadd.f32 %v1305_v6, %v716_v30  ;;  %v1002_v49 = vsub.f32 %v1571_v0, %v1592_v15  ;;  %v1771_v30 = vld [vmem:[%s1564_s17 + $0x80] sm:$0xff] }
  0xd6   : > { %v1651_v27 = vmul.f32 %v1629_v33, %v944_v35  ;;  %v913_v32 = vadd.f32 %v1554_v52, %v666_v44  ;;  %v1659_v50 = vadd.f32 1.0, %v1307_v38  ;;  %v1006_v23 = vsub.f32 %v1584_v9, %v1607_v19 }
  0xd7   : > { %992 = vst [vmem:[%s1604_s18 + $0x40] sm:$0xff] %v1638_v39  ;;  %v721_v51 = vsel %vm1644_vm7, %v1305_v6, %v717_v45  ;;  %1310 = vpow2.f32 %v588_v43  ;;  %v596_v53 = vmul.f32 1.442695, %v572_v37  ;;  %v784_v57 = vand.u32 2147483648, %v1589_v11 }
  0xd8   : > { %998 = vst [vmem:[%s1604_s18 + $0x70] sm:$0xff] %v1651_v27  ;;  %v1309_v54 = vpop.eup %1308  ;;  %v931_v55 = vmul.f32 0.5, %v913_v32  ;;  %v726_v56 = vsel %vm1632_vm6, %v725_v42, %v721_v51  ;;  %1312 = vrcp.f32 %v1659_v50  ;;  %vm778_vm8 = vweird.f32 %v1589_v11 }
  0xd9   : > { %v917_v58 = vadd.f32 %v1554_v52, %v726_v56  ;;  %v774_v59 = vmul.f32 %v1309_v54, %v1589_v11  ;;  %vm1677_vm9 = vcmp.eq.f32.partialorder %v782_v46, 8.507059e+37  ;;  %v1010_v62 = vsub.f32 %v1615_v25, %v1638_v39 }
  0xda   : > { %v1684_v63 = vmul.f32 %v1666_v47, %v931_v55  ;;  %1314 = vpow2.f32 %v596_v53  ;;  %v536_v2 = vmul.f32 %v1452_v17, %v502_v48  ;;  %v872_v8 = vand.u32 2147483647, %v1659_v50 }
  0xdb   : > { %v935_v5 = vmul.f32 0.5, %v917_v58  ;;  %v775_v7 = vsub.f32 1.0, %v774_v59  ;;  %v542_v10 = vmul.f32 %v1452_v17, %v517_v4  ;;  %v785_v6 = vor.u32 1.1754944e-38, %v784_v57 }
  0xdc   : > { %985 = vst [vmem:[%s1604_s18 + $0x8] sm:$0xff] %v1684_v63  ;;  %v874_v12 = vand.u32 2147483648, %v1659_v50  ;;  %v558_v13 = vadd.f32 %v1458_v21, %v536_v2  ;;  %v529_v14 = vmul.f32 %v1452_v17, %v484_v61  ;;  %v1016_v3 = vsub.f32 %v1629_v33, %v1651_v27  ;;  %v1735_v61 = vld [vmem:[%s1564_s17 + $0x48] sm:$0xff] }
  0xdd   : > { %v1311_v16 = vpop.eup %1310  ;;  %v1700_v18 = vmul.f32 %v1687_v1, %v935_v5  ;;  %v776_v20 = vmul.f32 %v1309_v54, %v775_v7  ;;  %vm779_vm10 = vweird.f32 %v1309_v54  ;;  %vm868_vm11 = vweird.f32 %v1659_v50 }
  0xde   : > { %v1313_v24 = vpop.eup %1312  ;;  %v1703_v26 = vadd.f32 1.0, %v1311_v16  ;;  %v576_v28 = vsub.f32 0.0, %v558_v13  ;;  %v564_v29 = vadd.f32 %v1458_v21, %v542_v10  ;;  %v1003_v31 = vsub.f32 %v1666_v47, %v1684_v63  ;;  %vm780_vm13 = vmor %vm778_vm8, %vm779_vm10 }
  0xdf   : > { %989 = vst [vmem:[%s1604_s18 + $0x28] sm:$0xff] %v1700_v18  ;;  %v777_v34 = vadd.f32 %v1309_v54, %v776_v20  ;;  %v864_v35 = vmul.f32 %v1313_v24, %v1659_v50  ;;  %vm1711_vm12 = vcmp.eq.f32.partialorder %v872_v8, 8.507059e+37  ;;  %v875_v38 = vor.u32 1.1754944e-38, %v874_v12  ;;  %v519_v50 = vpop.f32.mrf.mxu3 }
  0xe0   : > { %v1315_v37 = vpop.eup %1314  ;;  %1316 = vrcp.f32 %v1703_v26  ;;  %v551_v40 = vadd.f32 %v1458_v21, %v529_v14  ;;  %v533_v41 = vmul.f32 %v1452_v17, %v494_v22  ;;  %v604_v45 = vmul.f32 1.442695, %v576_v28  ;;  %v1757_v22 = vld [vmem:[%s1564_s17 + $0x78] sm:$0xff]  ;;  %v1761_v28 = vld [vmem:[%s1564_s17 + $0x10] sm:$0xff] }
  0xe1   : > { %v781_v42 = vsel %vm780_vm13, %v1309_v54, %v777_v34  ;;  %v865_v43 = vsub.f32 1.0, %v864_v35  ;;  %v1720_v44 = vadd.f32 1.0, %v1315_v37  ;;  %v679_v48 = vand.u32 2147483648, %v1703_v26  ;;  %v1765_v34 = vld [vmem:[%s1564_s17 + $0x30] sm:$0xff] }
  0xe2   : > { %v786_v46 = vsel %vm1677_vm9, %v785_v6, %v781_v42  ;;  %v582_v11 = vsub.f32 0.0, %v564_v29  ;;  %v537_v32 = vmul.f32 %v1452_v17, %v504_v36  ;;  %vm869_vm14 = vweird.f32 %v1313_v24  ;;  %v1768_v35 = vld [vmem:[%s1564_s17 + $0x50] sm:$0xff]  ;;  %v1782_v42 = vld [vmem:[%s1564_s17 + $0x58] sm:$0xff] }
  0xe3   : > { %v921_v51 = vadd.f32 %v1554_v52, %v786_v46  ;;  %v866_v53 = vmul.f32 %v1313_v24, %v865_v43  ;;  %1318 = vrcp.f32 %v1720_v44  ;;  %v1007_v54 = vsub.f32 %v1687_v1, %v1700_v18  ;;  %vm870_vm0 = vmor %vm868_vm11, %vm869_vm14 }
  0xe4   : > { %vm673_vm15 = vweird.f32 %v1703_v26  ;;  %1320 = vpow2.f32 %v604_v45  ;;  %v616_v55 = vmul.f32 1.442695, %v582_v11  ;;  %v569_v58 = vsub.f32 0.0, %v551_v40 }
  0xe5   : > { %v939_v56 = vmul.f32 0.5, %v921_v51  ;;  %v867_v57 = vadd.f32 %v1313_v24, %v866_v53  ;;  %v555_v59 = vadd.f32 %v1458_v21, %v533_v41  ;;  %v677_v2 = vand.u32 2147483647, %v1703_v26  ;;  %v1779_v41 = vld [vmem:[%s1564_s17 + $0x38] sm:$0xff]  ;;  %v1799_v51 = vld [vmem:[%s1564_s17 + $0x60] sm:$0xff]  ;;  %v1802_v53 = vld [vmem:[%s1564_s17 + $0x68] sm:$0xff] }
  0xe6   : > { %v1732_v60 = vpop.eup %1316  ;;  %v1740_v4 = vor.u32 1.1754944e-38, %v679_v48  ;;  %1322 = vpow2.f32 %v616_v55  ;;  %v559_v5 = vadd.f32 %v1458_v21, %v537_v32  ;;  %vm733_vm1 = vweird.f32 %v1720_v44  ;;  %v1796_v32 = vld [vmem:[%s1564_s17 + $0x88] sm:$0xff] }
  0xe7   : > { %v1744_v7 = vmul.f32 %v1735_v61, %v939_v56  ;;  %v871_v8 = vsel %vm870_vm0, %v1313_v24, %v867_v57  ;;  %v669_v10 = vmul.f32 %v1732_v60, %v1703_v26  ;;  %v590_v12 = vmul.f32 1.442695, %v569_v58 }
  0xe8   : > { %v876_v6 = vsel %vm1711_vm12, %v875_v38, %v871_v8  ;;  %v573_v13 = vsub.f32 0.0, %v555_v59  ;;  %v577_v14 = vsub.f32 0.0, %v559_v5  ;;  %vm674_vm2 = vweird.f32 %v1732_v60  ;;  %v1776_v38 = vld [vmem:[%s1564_s17 + $0x18] sm:$0xff] }
  0xe9   : > { %v1751_v16 = vpop.eup %1318  ;;  %993 = vst [vmem:[%s1604_s18 + $0x48] sm:$0xff] %v1744_v7  ;;  %v927_v20 = vadd.f32 %v1554_v52, %v876_v6  ;;  %v670_v24 = vsub.f32 1.0, %v669_v10  ;;  %v737_v29 = vand.u32 2147483647, %v1720_v44  ;;  %1324 = vpow2.f32 %v590_v12  ;;  %vm1808_vm3 = vmor %vm673_vm15, %vm674_vm2 }
  0xea   : > { %v1321_v36 = vpop.eup %1320  ;;  %v729_v37 = vmul.f32 %v1751_v16, %v1720_v44  ;;  %v598_v40 = vmul.f32 1.442695, %v573_v13  ;;  %v543_v43 = vmul.f32 %v1452_v17, %v519_v50  ;;  %v739_v48 = vand.u32 2147483648, %v1720_v44  ;;  %1020 = vst [vmem:[%s1789_s21] sm:$0xff] %v1002_v49 }
  0xeb   : > { %v945_v45 = vmul.f32 0.5, %v927_v20  ;;  %v671_v46 = vmul.f32 %v1732_v60, %v670_v24  ;;  %v1793_v11 = vadd.f32 1.0, %v1321_v36  ;;  %vm734_vm4 = vweird.f32 %v1751_v16  ;;  %1021 = vst [vmem:[%s1789_s21 + $0x8] sm:$0xff] %v1003_v31 }
  0xec   : > { %v1323_v55 = vpop.eup %1322  ;;  %v730_v57 = vsub.f32 1.0, %v729_v37  ;;  %1326 = vpow2.f32 %v598_v40  ;;  %v606_v58 = vmul.f32 1.442695, %v577_v14  ;;  %vm1819_vm5 = vcmp.eq.f32.partialorder %v677_v2, 8.507059e+37  ;;  %1024 = vst [vmem:[%s1789_s21 + $0x20] sm:$0xff] %v1006_v23  ;;  %vm1846_vm6 = vmor %vm733_vm1, %vm734_vm4  ;;  %v507_v23 = vpop.f32.mrf.mxu2 }
  0xed   : > { %v981_v59 = vmul.f32 %v1757_v22, %v945_v45  ;;  %v672_v5 = vadd.f32 %v1732_v60, %v671_v46  ;;  %1328 = vrcp.f32 %v1793_v11  ;;  %v1011_v8 = vsub.f32 %v1735_v61, %v1744_v7  ;;  %1025 = vst [vmem:[%s1789_s21 + $0x28] sm:$0xff] %v1007_v54 }
  0xee   : > { %v731_v0 = vmul.f32 %v1751_v16, %v730_v57  ;;  %v1831_v15 = vadd.f32 1.0, %v1323_v55  ;;  %v565_v49 = vadd.f32 %v1458_v21, %v543_v43  ;;  %vm1850_vm7 = vcmp.eq.f32.partialorder %v737_v29, 8.507059e+37  ;;  %1028 = vst [vmem:[%s1789_s21 + $0x40] sm:$0xff] %v1010_v62 }
  0xef   : > { %999 = vst [vmem:[%s1604_s18 + $0x78] sm:$0xff] %v981_v59  ;;  %v676_v47 = vsel %vm1808_vm3, %v1732_v60, %v672_v5  ;;  %v740_v9 = vor.u32 1.1754944e-38, %v739_v48  ;;  %v797_v19 = vand.u32 2147483647, %v1793_v11  ;;  %v1325_v61 = vpop.eup %1324  ;;  %v1017_v60 = vsub.f32 %v1757_v22, %v981_v59 }
  0xf0   : > { %v681_v44 = vsel %vm1819_vm5, %v1740_v4, %v676_v47  ;;  %v732_v2 = vadd.f32 %v1751_v16, %v731_v0  ;;  %1330 = vpow2.f32 %v606_v58  ;;  %v799_v10 = vand.u32 2147483648, %v1793_v11  ;;  %1029 = vst [vmem:[%s1789_s21 + $0x48] sm:$0xff] %v1011_v8 }
  0xf1   : > { %v914_v7 = vadd.f32 %v1554_v52, %v681_v44  ;;  %1332 = vrcp.f32 %v1831_v15  ;;  %v1874_v6 = vadd.f32 1.0, %v1325_v61  ;;  %v583_v1 = vsub.f32 0.0, %v565_v49  ;;  %1034 = vst [vmem:[%s1789_s21 + $0x70] sm:$0xff] %v1016_v3 }
  0xf2   : > { %v1327_v50 = vpop.eup %1326  ;;  %v736_v4 = vsel %vm1846_vm6, %v1751_v16, %v732_v2  ;;  %v1877_v18 = vmul.f32 %v1452_v17, %v507_v23  ;;  %v887_v25 = vand.u32 2147483647, %v1831_v15  ;;  %vm793_vm8 = vweird.f32 %v1793_v11  ;;  %1035 = vst [vmem:[%s1789_s21 + $0x78] sm:$0xff] %v1017_v60 }
  0xf3   : > { %v1329_v54 = vpop.eup %1328  ;;  %v932_v12 = vmul.f32 0.5, %v914_v7  ;;  %v741_v13 = vsel %vm1850_vm7, %v740_v9, %v736_v4  ;;  %v1883_v39 = vadd.f32 1.0, %v1327_v50  ;;  %vm1892_vm9 = vcmp.eq.f32.partialorder %v797_v19, 8.507059e+37 }
  0xf4   : > { %v918_v62 = vadd.f32 %v1554_v52, %v741_v13  ;;  %v789_v14 = vmul.f32 %v1329_v54, %v1793_v11  ;;  %v800_v22 = vor.u32 1.1754944e-38, %v799_v10  ;;  %v889_v24 = vand.u32 2147483648, %v1831_v15 }
  0xf5   : > { %v968_v20 = vmul.f32 %v1761_v28, %v932_v12  ;;  %1334 = vrcp.f32 %v1874_v6  ;;  %v618_v29 = vmul.f32 1.442695, %v583_v1  ;;  %vm883_vm10 = vweird.f32 %v1831_v15 }
  0xf6   : > { %v1331_v33 = vpop.eup %1330  ;;  %v936_v27 = vmul.f32 0.5, %v918_v62  ;;  %v790_v3 = vsub.f32 1.0, %v789_v14  ;;  %1336 = vrcp.f32 %v1883_v39  ;;  %vm1904_vm11 = vcmp.eq.f32.partialorder %v887_v25, 8.507059e+37 }
  0xf7   : > { %v1333_v36 = vpop.eup %1332  ;;  %986 = vst [vmem:[%s1604_s18 + $0x10] sm:$0xff] %v968_v20  ;;  %v1004_v37 = vsub.f32 %v1761_v28, %v968_v20  ;;  %v692_v43 = vand.u32 2147483647, %v1874_v6  ;;  %vm794_vm12 = vweird.f32 %v1329_v54  ;;  %v890_v55 = vor.u32 1.1754944e-38, %v889_v24 }
  0xf8   : > { %v972_v45 = vmul.f32 %v1765_v34, %v936_v27  ;;  %v791_v46 = vmul.f32 %v1329_v54, %v790_v3  ;;  %v879_v48 = vmul.f32 %v1333_v36, %v1831_v15  ;;  %vm884_vm13 = vweird.f32 %v1333_v36  ;;  %vm795_vm14 = vmor %vm793_vm8, %vm794_vm12 }
  0xf9   : > { %v694_v56 = vand.u32 2147483648, %v1874_v6  ;;  %v1912_v57 = vadd.f32 1.0, %v1331_v33  ;;  %1022 = vst [vmem:[%s1789_s21 + $0x10] sm:$0xff] %v1004_v37  ;;  %1338 = vpow2.f32 %v618_v29  ;;  %vm688_vm15 = vweird.f32 %v1874_v6  ;;  %vm1934_vm1 = vmor %vm883_vm10, %vm884_vm13 }
  0xfa   : > { %990 = vst [vmem:[%s1604_s18 + $0x30] sm:$0xff] %v972_v45  ;;  %v1008_v28 = vsub.f32 %v1765_v34, %v972_v45  ;;  %v792_v58 = vadd.f32 %v1329_v54, %v791_v46  ;;  %v880_v59 = vsub.f32 1.0, %v879_v48  ;;  %vm1920_vm0 = vcmp.eq.f32.partialorder %v692_v43, 8.507059e+37 }
  0xfb   : > { %v1335_v5 = vpop.eup %1334  ;;  %v752_v8 = vand.u32 2147483647, %v1883_v39  ;;  %1340 = vrcp.f32 %v1912_v57  ;;  %v754_v63 = vand.u32 2147483648, %v1883_v39  ;;  %v695_v9 = vor.u32 1.1754944e-38, %v694_v56 }
  0xfc   : > { %v1337_v0 = vpop.eup %1336  ;;  %v796_v49 = vsel %vm795_vm14, %v1329_v54, %v792_v58  ;;  %v881_v34 = vmul.f32 %v1333_v36, %v880_v59  ;;  %v684_v47 = vmul.f32 %v1335_v5, %v1874_v6  ;;  %1026 = vst [vmem:[%s1789_s21 + $0x30] sm:$0xff] %v1008_v28  ;;  %vm748_vm2 = vweird.f32 %v1883_v39  ;;  %v509_v54 = vpop.f32.mrf.mxu2 }
  0xfd   : > { %v801_v11 = vsel %vm1892_vm9, %v800_v22, %v796_v49  ;;  %v744_v19 = vmul.f32 %v1337_v0, %v1883_v39  ;;  %vm689_vm3 = vweird.f32 %v1335_v5  ;;  %vm749_vm4 = vweird.f32 %v1337_v0 }
  0xfe   : > { %v922_v23 = vadd.f32 %v1554_v52, %v801_v11  ;;  %v882_v61 = vadd.f32 %v1333_v36, %v881_v34  ;;  %v685_v60 = vsub.f32 1.0, %v684_v47  ;;  %vm1941_vm5 = vcmp.eq.f32.partialorder %v752_v8, 8.507059e+37  ;;  %vm1953_vm6 = vmor %vm688_vm15, %vm689_vm3 }
  0xff   : > { %v745_v44 = vsub.f32 1.0, %v744_v19  ;;  %v560_v15 = vadd.f32 %v1458_v21, %v1877_v18  ;;  %v1339_v7 = vpop.eup %1338  ;;  %v755_v1 = vor.u32 1.1754944e-38, %v754_v63  ;;  %v812_v62 = vand.u32 2147483647, %v1912_v57  ;;  %vm1965_vm7 = vmor %vm748_vm2, %vm749_vm4 }
 0x100   : > { %v940_v10 = vmul.f32 0.5, %v922_v23  ;;  %v886_v50 = vsel %vm1934_vm1, %v1333_v36, %v882_v61  ;;  %v686_v4 = vmul.f32 %v1335_v5, %v685_v60  ;;  %v1958_v14 = vadd.f32 1.0, %v1339_v7 }
 0x101   : > { %v1341_v12 = vpop.eup %1340  ;;  %v891_v13 = vsel %vm1904_vm11, %v890_v55, %v886_v50  ;;  %v746_v18 = vmul.f32 %v1337_v0, %v745_v44  ;;  %v578_v27 = vsub.f32 0.0, %v560_v15  ;;  %v539_v3 = vmul.f32 %v1452_v17, %v509_v54 }
 0x102   : > { %v976_v16 = vmul.f32 %v1768_v35, %v940_v10  ;;  %v928_v20 = vadd.f32 %v1554_v52, %v891_v13  ;;  %v687_v22 = vadd.f32 %v1335_v5, %v686_v4  ;;  %v804_v6 = vmul.f32 %v1341_v12, %v1912_v57 }
 0x103   : > { %v747_v33 = vadd.f32 %v1337_v0, %v746_v18  ;;  %1342 = vrcp.f32 %v1958_v14  ;;  %vm809_vm8 = vweird.f32 %v1341_v12  ;;  %v814_v45 = vand.u32 2147483648, %v1912_v57 }
 0x104   : > { %994 = vst [vmem:[%s1604_s18 + $0x50] sm:$0xff] %v976_v16  ;;  %v1012_v29 = vsub.f32 %v1768_v35, %v976_v16  ;;  %v946_v36 = vmul.f32 0.5, %v928_v20  ;;  %v691_v39 = vsel %vm1953_vm6, %v1335_v5, %v687_v22  ;;  %v805_v37 = vsub.f32 1.0, %v804_v6 }
 0x105   : > { %v696_v40 = vsel %vm1920_vm0, %v695_v9, %v691_v39  ;;  %v751_v43 = vsel %vm1965_vm7, %v1337_v0, %v747_v33  ;;  %vm808_vm9 = vweird.f32 %v1912_v57  ;;  %v608_v56 = vmul.f32 1.442695, %v578_v27 }
 0x106   : > { %v982_v17 = vmul.f32 %v1771_v30, %v946_v36  ;;  %v915_v46 = vadd.f32 %v1554_v52, %v696_v40  ;;  %v756_v35 = vsel %vm1941_vm5, %v755_v1, %v751_v43  ;;  %v806_v48 = vmul.f32 %v1341_v12, %v805_v37  ;;  %1030 = vst [vmem:[%s1789_s21 + $0x50] sm:$0xff] %v1012_v29  ;;  %vm810_vm10 = vmor %vm808_vm9, %vm809_vm8 }
 0x107   : > { %v919_v55 = vadd.f32 %v1554_v52, %v756_v35  ;;  %v561_v5 = vadd.f32 %v1458_v21, %v539_v3  ;;  %v815_v0 = vor.u32 1.1754944e-38, %v814_v45  ;;  %1344 = vpow2.f32 %v608_v56 }
 0x108   : > { %1000 = vst [vmem:[%s1604_s18 + $0x80] sm:$0xff] %v982_v17  ;;  %v1018_v28 = vsub.f32 %v1771_v30, %v982_v17  ;;  %v933_v58 = vmul.f32 0.5, %v915_v46  ;;  %v807_v59 = vadd.f32 %v1341_v12, %v806_v48  ;;  %vm813_vm11 = vcmp.eq.f32.partialorder %v812_v62, 8.507059e+37 }
 0x109   : > { %v1343_v26 = vpop.eup %1342  ;;  %v937_v8 = vmul.f32 0.5, %v919_v55  ;;  %v579_v63 = vsub.f32 0.0, %v561_v5  ;;  %vm898_vm12 = vweird.f32 %v1958_v14  ;;  %v904_v19 = vand.u32 2147483648, %v1958_v14 }
 0x10a   : > { %v969_v49 = vmul.f32 %v1776_v38, %v933_v58  ;;  %v811_v57 = vsel %vm810_vm10, %v1341_v12, %v807_v59  ;;  %v894_v34 = vmul.f32 %v1343_v26, %v1958_v14  ;;  %1036 = vst [vmem:[%s1789_s21 + $0x80] sm:$0xff] %v1018_v28  ;;  %vm899_vm13 = vweird.f32 %v1343_v26 }
 0x10b   : > { %v973_v30 = vmul.f32 %v1779_v41, %v937_v8  ;;  %v816_v47 = vsel %vm813_vm11, %v815_v0, %v811_v57  ;;  %v610_v23 = vmul.f32 1.442695, %v579_v63  ;;  %v902_v44 = vand.u32 2147483647, %v1958_v14  ;;  %vm900_vm14 = vmor %vm898_vm12, %vm899_vm13 }
 0x10c   : > { %987 = vst [vmem:[%s1604_s18 + $0x18] sm:$0xff] %v969_v49  ;;  %v1005_v21 = vsub.f32 %v1776_v38, %v969_v49  ;;  %v923_v11 = vadd.f32 %v1554_v52, %v816_v47  ;;  %v895_v31 = vsub.f32 1.0, %v894_v34  ;;  %v905_v7 = vor.u32 1.1754944e-38, %v904_v19 }
 0x10d   : > { %991 = vst [vmem:[%s1604_s18 + $0x38] sm:$0xff] %v973_v30  ;;  %v1009_v9 = vsub.f32 %v1779_v41, %v973_v30  ;;  %v1345_v38 = vpop.eup %1344  ;;  %1346 = vpow2.f32 %v610_v23  ;;  %vm903_vm15 = vcmp.eq.f32.partialorder %v902_v44, 8.507059e+37 }
 0x10e   : > { %v941_v61 = vmul.f32 0.5, %v923_v11  ;;  %v896_v60 = vmul.f32 %v1343_v26, %v895_v31  ;;  %1023 = vst [vmem:[%s1789_s21 + $0x18] sm:$0xff] %v1005_v21  ;;  %v632_v41 = vadd.f32 1.0, %v1345_v38 }
 0x10f   : > { %1027 = vst [vmem:[%s1789_s21 + $0x38] sm:$0xff] %v1009_v9 }
 0x110   : > { %v977_v2 = vmul.f32 %v1782_v42, %v941_v61  ;;  %v897_v15 = vadd.f32 %v1343_v26, %v896_v60  ;;  %1348 = vrcp.f32 %v632_v41  ;;  %v829_v16 = vand.u32 2147483648, %v632_v41 }
 0x111   : > { %v827_v22 = vand.u32 2147483647, %v632_v41  ;;  %vm823_vm1 = vweird.f32 %v632_v41 }
 0x112   : > { %995 = vst [vmem:[%s1604_s18 + $0x58] sm:$0xff] %v977_v2  ;;  %v1013_v10 = vsub.f32 %v1782_v42, %v977_v2  ;;  %v901_v50 = vsel %vm900_vm14, %v1343_v26, %v897_v15  ;;  %v830_v27 = vor.u32 1.1754944e-38, %v829_v16 }
 0x113   : > { %v906_v4 = vsel %vm903_vm15, %v905_v7, %v901_v50  ;;  %v1347_v54 = vpop.eup %1346  ;;  %vm828_vm3 = vcmp.eq.f32.partialorder %v827_v22, 8.507059e+37 }
 0x114   : > { %v929_v1 = vadd.f32 %v1554_v52, %v906_v4  ;;  %1031 = vst [vmem:[%s1789_s21 + $0x58] sm:$0xff] %v1013_v10  ;;  %v633_v13 = vadd.f32 1.0, %v1347_v54 }
 0x116   : > { %v947_v12 = vmul.f32 0.5, %v929_v1  ;;  %v1349_v25 = vpop.eup %1348  ;;  %1350 = vrcp.f32 %v633_v13  ;;  %v844_v39 = vand.u32 2147483648, %v633_v13  ;;  %v842_v40 = vand.u32 2147483647, %v633_v13 }
 0x117   : > { %v819_v62 = vmul.f32 %v1349_v25, %v632_v41  ;;  %vm824_vm0 = vweird.f32 %v1349_v25  ;;  %vm838_vm5 = vweird.f32 %v633_v13 }
 0x118   : > { %v983_v18 = vmul.f32 %v1796_v32, %v947_v12  ;;  %vm825_vm2 = vmor %vm823_vm1, %vm824_vm0  ;;  %v845_v17 = vor.u32 1.1754944e-38, %v844_v39  ;;  %vm843_vm7 = vcmp.eq.f32.partialorder %v842_v40, 8.507059e+37 }
 0x119   : > { %v820_v42 = vsub.f32 1.0, %v819_v62 }
 0x11a   : > { %1001 = vst [vmem:[%s1604_s18 + $0x88] sm:$0xff] %v983_v18  ;;  %v1019_v14 = vsub.f32 %v1796_v32, %v983_v18 }
 0x11b   : > { %v821_v20 = vmul.f32 %v1349_v25, %v820_v42 }
 0x11c   : > { %1037 = vst [vmem:[%s1789_s21 + $0x88] sm:$0xff] %v1019_v14  ;;  %v1351_v24 = vpop.eup %1350 }
 0x11d   : > { %v822_v6 = vadd.f32 %v1349_v25, %v821_v20  ;;  %v834_v33 = vmul.f32 %v1351_v24, %v633_v13  ;;  %vm839_vm4 = vweird.f32 %v1351_v24 }
 0x11e   : > { %vm840_vm6 = vmor %vm838_vm5, %vm839_vm4 }
 0x11f   : > { %v826_v3 = vsel %vm825_vm2, %v1349_v25, %v822_v6  ;;  %v835_v29 = vsub.f32 1.0, %v834_v33 }
 0x120   : > { %v831_v36 = vsel %vm828_vm3, %v830_v27, %v826_v3 }
 0x121   : > { %v924_v32 = vadd.f32 %v1554_v52, %v831_v36  ;;  %v836_v37 = vmul.f32 %v1351_v24, %v835_v29 }
 0x123   : > { %v942_v43 = vmul.f32 0.5, %v924_v32  ;;  %v837_v45 = vadd.f32 %v1351_v24, %v836_v37 }
 0x125   : > { %v978_v46 = vmul.f32 %v1799_v51, %v942_v43  ;;  %v841_v35 = vsel %vm840_vm6, %v1351_v24, %v837_v45 }
 0x126   : > { %v846_v48 = vsel %vm843_vm7, %v845_v17, %v841_v35 }
 0x127   : > { %996 = vst [vmem:[%s1604_s18 + $0x60] sm:$0xff] %v978_v46  ;;  %v1014_v55 = vsub.f32 %v1799_v51, %v978_v46  ;;  %v925_v56 = vadd.f32 %v1554_v52, %v846_v48 }
 0x129   : > { %v943_v28 = vmul.f32 0.5, %v925_v56  ;;  %1032 = vst [vmem:[%s1789_s21 + $0x60] sm:$0xff] %v1014_v55 }
 0x12b   : > { %v979_v58 = vmul.f32 %v1802_v53, %v943_v28 }
 0x12d   : > { %997 = vst [vmem:[%s1604_s18 + $0x68] sm:$0xff] %v979_v58  ;;  %v1015_v59 = vsub.f32 %v1802_v53, %v979_v58 }
 0x12f   : > { %1033 = vst [vmem:[%s1789_s21 + $0x68] sm:$0xff] %v1015_v59 }
 0x130 PF: > { %s18_s24 = sadd.s32 1, %s1358_s24  }
 0x131   : > { %p15_p5 = scmp.ge.s32.totalorder %s18_s24, 6  }
 0x133   :  { %17 = sbr.rel (!%p15_p5) target bundleno = 1 (0x1), region = 92 }

</bundles_post_ra>
